<compile_context>
chip_gen: v7x
topology: tpu7x:2x2x1
jax: 0.10.0
libtpu: 0.0.40
codegen_flags: <defaults>
</compile_context>

<pallas_src>
import jax
import jax.numpy as jnp
from jax.experimental import pallas as pl
from jax.experimental.pallas import tpu as pltpu

LAYERS = [2, 20, 20, 20, 20, 20, 3]
NUM_LIN = len(LAYERS) - 1                     # 6 linear layers (5 hidden + 1 output)


def _round_up(x, m):
    return (x + m - 1) // m * m


PAD_F = _round_up(max(LAYERS), 8)             # 24: padded feature (sublane) width
OUT_PAD = _round_up(LAYERS[-1], 8)            # 8:  padded output feature width


def _mlp_kernel(x_ref, wh_ref, bh_ref, wo_ref, bo_ref, o_ref, h0_ref):
    """Full MLP forward for one lane-tile of batch columns, entirely in VMEM.

    x_ref:  (2, TILE_N)            input points, batch on lanes
    wh_ref: (5, PAD_F, PAD_F)      hidden-layer weights (out, in), zero padded
    bh_ref: (5, PAD_F, 1)          hidden-layer biases, zero padded (f32)
    wo_ref: (OUT_PAD, PAD_F)       final-layer weights, zero padded
    bo_ref: (OUT_PAD, 1)           final-layer bias, zero padded (f32)
    o_ref:  (3, TILE_N)            output, batch on lanes
    h0_ref: (PAD_F, TILE_N) f32    VMEM scratch holding the zero-padded input
    """
    cdt = wh_ref.dtype                        # MXU operand dtype (f32 or bf16)

    # Widen the 2-row input to the padded 24-row activation. Rows 2:24 must be
    # exactly zero (uninitialized VMEM could hold NaN bit patterns), so zero the
    # scratch every grid step (cheap, and megacore-safe) before the partial store.
    h0_ref[...] = jnp.zeros_like(h0_ref)
    h0_ref[:LAYERS[0], :] = x_ref[...]
    h = h0_ref[...]                           # (PAD_F, TN) f32

    # Hidden layers: Linear + Tanh. Zero-padded weight rows/cols & biases keep the
    # padded activation rows at tanh(0) == 0 throughout.
    for l in range(NUM_LIN - 1):
        z = jnp.dot(wh_ref[l], h.astype(cdt),
                    preferred_element_type=jnp.float32) + bh_ref[l]
        h = jnp.tanh(z)                       # f32 tanh (correct on every generation)

    # Final Linear: compute only the 8 padded output rows, store the 3 real ones.
    out = jnp.dot(wo_ref[...], h.astype(cdt),
                  preferred_element_type=jnp.float32) + bo_ref[...]   # (OUT_PAD, TN)
    o_ref[...] = out[:LAYERS[-1], :].astype(o_ref.dtype)


def pack_params(params, param_dtype=jnp.float32):
    """Pack torch-style (out, in) weights / (out,) biases into padded slabs."""
    assert len(params) == NUM_LIN
    w_hid = jnp.zeros((NUM_LIN - 1, PAD_F, PAD_F), param_dtype)
    b_hid = jnp.zeros((NUM_LIN - 1, PAD_F, 1), jnp.float32)
    for l, (w, b) in enumerate(params[:-1]):
        fo, fi = w.shape
        w_hid = w_hid.at[l, :fo, :fi].set(w.astype(param_dtype))
        b_hid = b_hid.at[l, :fo, 0].set(b.astype(jnp.float32))
    w_last, b_last = params[-1]
    fo, fi = w_last.shape
    w_out = jnp.zeros((OUT_PAD, PAD_F), param_dtype).at[:fo, :fi].set(
        w_last.astype(param_dtype))
    b_out = jnp.zeros((OUT_PAD, 1), jnp.float32).at[:fo, 0].set(
        b_last.astype(jnp.float32))
    return w_hid, b_hid, w_out, b_out


def _auto_param_dtype():
    """bf16 MXU operands on v6e/v7x (bf16 VPU/EUP present), f32 elsewhere (v5e etc.)."""
    try:
        kind = jax.devices()[0].device_kind.lower()
    except Exception:
        return jnp.float32
    if ("v6" in kind) or ("v7" in kind):
        return jnp.bfloat16
    return jnp.float32


def _pick_tile(n, tile_n):
    """Lane tile: multiple of 128, as large as requested, but keep grid >= 2 when
    the batch allows so the single 'parallel' grid axis can use both v7x TCs."""
    lanes = _round_up(max(n, 1), 128)
    tile = max(128, min(_round_up(tile_n, 128), lanes))
    if tile >= lanes and lanes >= 256:
        tile = _round_up(lanes // 2, 128)
    n_pad = _round_up(n, tile)
    return tile, n_pad


def dnn_forward_lanes(x_t, params, *, tile_n=2048, param_dtype=None):
    """Batch-on-lanes API: x_t of shape (2, N) -> output of shape (3, N).

    Use this directly from a PINN loss to avoid wrapper transpose passes.
    """
    in_dim, N = x_t.shape
    assert in_dim == LAYERS[0]
    if param_dtype is None:
        param_dtype = _auto_param_dtype()

    tile, n_pad = _pick_tile(N, tile_n)

    if n_pad == N:
        xp = x_t.astype(jnp.float32)
    else:
        xp = jnp.zeros((in_dim, n_pad), jnp.float32).at[:, :N].set(
            x_t.astype(jnp.float32))

    w_hid, b_hid, w_out, b_out = pack_params(params, param_dtype)

    out = pl.pallas_call(
        _mlp_kernel,
        out_shape=jax.ShapeDtypeStruct((LAYERS[-1], n_pad), jnp.float32),
        grid_spec=pltpu.PrefetchScalarGridSpec(
            num_scalar_prefetch=0,
            grid=(n_pad // tile,),
            in_specs=[
                pl.BlockSpec((LAYERS[0], tile), lambda i: (0, i)),
                # Parameters: full-array blocks, constant index_map -> fetched once,
                # resident in VMEM for every grid step.
                pl.BlockSpec((NUM_LIN - 1, PAD_F, PAD_F), lambda i: (0, 0, 0)),
                pl.BlockSpec((NUM_LIN - 1, PAD_F, 1), lambda i: (0, 0, 0)),
                pl.BlockSpec((OUT_PAD, PAD_F), lambda i: (0, 0)),
                pl.BlockSpec((OUT_PAD, 1), lambda i: (0, 0)),
            ],
            out_specs=pl.BlockSpec((LAYERS[-1], tile), lambda i: (0, i)),
            scratch_shapes=[pltpu.VMEM((PAD_F, tile), jnp.float32)],
        ),
        compiler_params=pltpu.CompilerParams(
            dimension_semantics=("parallel",)),
    )(xp, w_hid, b_hid, w_out, b_out)

    if n_pad != N:
        out = out[:, :N]
    return out


def dnn_forward(x, params, *, tile_n=2048, param_dtype=None):
    """PyTorch-convention wrapper: x (N, 2) -> (N, 3)."""
    out_t = dnn_forward_lanes(x.T, params, tile_n=tile_n, param_dtype=param_dtype)
    return out_t.T


def init_params(key, layers):
    """PyTorch-default-style init: U(-1/sqrt(fan_in), 1/sqrt(fan_in)).

    Weights are torch.nn.Linear-layout (out_features, in_features); biases (out,).
    """
    params = []
    for i in range(len(layers) - 1):
        fan_in, fan_out = layers[i], layers[i + 1]
        key, kw, kb = jax.random.split(key, 3)
        bound = 1.0 / jnp.sqrt(jnp.float32(fan_in))
        w = jax.random.uniform(kw, (fan_out, fan_in), jnp.float32, -bound, bound)
        b = jax.random.uniform(kb, (fan_out,), jnp.float32, -bound, bound)
        params.append((w, b))
    return params


def dnn_reference(x, params):
    """Plain-JAX reference of the same forward pass (torch Linear semantics)."""
    h = x
    for (w, b) in params[:-1]:
        h = jnp.tanh(h @ w.T + b)
    w, b = params[-1]
    return h @ w.T + b


if __name__ == "__main__":
    key = jax.random.PRNGKey(0)
    key, kx = jax.random.split(key)

    # Batch of (x, t) collocation points (layers[0] == 2). N chosen so the default
    # 2048-lane tile still yields grid >= 2 (both v7x TensorCores stay busy).
    N = 4096
    x = jax.random.uniform(kx, (N, LAYERS[0]), jnp.float32, -1.0, 1.0)

    params = init_params(key, LAYERS)
    ref = dnn_reference(x, params)

    # Exact-semantics f32 path (valid and fast on every generation).
    out_f32 = jax.block_until_ready(dnn_forward(x, params, param_dtype=jnp.float32))
    assert out_f32.shape == (N, LAYERS[-1])
    assert jnp.allclose(out_f32, ref, atol=1e-5, rtol=1e-5), \
        "Pallas f32 output mismatch vs reference"

    # Generation-tuned path (bf16 MXU operands on v6e/v7x): loose-tolerance sanity check.
    auto_dt = _auto_param_dtype()
    if auto_dt != jnp.float32:
        out_auto = jax.block_until_ready(dnn_forward(x, params, param_dtype=auto_dt))
        assert bool(jnp.all(jnp.isfinite(out_auto)))
        assert jnp.allclose(out_auto, ref, atol=1e-1, rtol=1e-1), \
            "Pallas bf16 output mismatch vs reference"

    print("KERNEL_OK")
</pallas_src>

<mosaic_0001>
module attributes {stable_mosaic.version = 11 : i64} {
  func.func @_mlp_kernel(%arg0: i32, %arg1: memref<2x2048xf32, #tpu.memory_space<vmem>>, %arg2: memref<5x24x24xf32, #tpu.memory_space<vmem>>, %arg3: memref<5x24x1xf32, #tpu.memory_space<vmem>>, %arg4: memref<8x24xf32, #tpu.memory_space<vmem>>, %arg5: memref<8x1xf32, #tpu.memory_space<vmem>>, %arg6: memref<3x2048xf32, #tpu.memory_space<vmem>>, %arg7: memref<24x2048xf32, #tpu.memory_space<vmem>>) attributes {dimension_semantics = [#tpu.dimension_semantics<parallel>], iteration_bounds = array<i64: 2>, scalar_prefetch = 0 : i64, scratch_operands = 1 : i64, tpu.core_type = #tpu.core_type<tc>, window_params = [{transform_indices = @transform_0, window_bounds = array<i64: 2, 2048>}, {pipeline_mode = #tpu.pipeline_mode<synchronous>, transform_indices = @transform_1, window_bounds = array<i64: 5, 24, 24>}, {pipeline_mode = #tpu.pipeline_mode<synchronous>, transform_indices = @transform_2, window_bounds = array<i64: 5, 24, 1>}, {pipeline_mode = #tpu.pipeline_mode<synchronous>, transform_indices = @transform_3, window_bounds = array<i64: 8, 24>}, {pipeline_mode = #tpu.pipeline_mode<synchronous>, transform_indices = @transform_4, window_bounds = array<i64: 8, 1>}, {transform_indices = @transform_5, window_bounds = array<i64: 3, 2048>}]} {
    %cst = arith.constant 0.000000e+00 : f32
    %0 = vector.broadcast %cst : f32 to vector<24x2048xf32>
    %c0 = arith.constant 0 : index
    %c0_0 = arith.constant 0 : index
    %1 = vector.load %arg7[%c0, %c0_0] : memref<24x2048xf32, #tpu.memory_space<vmem>>, vector<24x2048xf32>
    tpu.vector_store %arg7[%c0, %c0_0], %0 {strides = array<i32>} : memref<24x2048xf32, #tpu.memory_space<vmem>>, vector<24x2048xf32>,
    %c0_1 = arith.constant 0 : index
    %c0_2 = arith.constant 0 : index
    %2 = vector.load %arg1[%c0_1, %c0_2] : memref<2x2048xf32, #tpu.memory_space<vmem>>, vector<2x2048xf32>
    %c0_3 = arith.constant 0 : index
    %c0_4 = arith.constant 0 : index
    %3 = vector.load %arg7[%c0_3, %c0_4] : memref<24x2048xf32, #tpu.memory_space<vmem>>, vector<2x2048xf32>
    tpu.vector_store %arg7[%c0_3, %c0_4], %2 {strides = array<i32>} : memref<24x2048xf32, #tpu.memory_space<vmem>>, vector<2x2048xf32>,
    %c0_5 = arith.constant 0 : index
    %c0_6 = arith.constant 0 : index
    %4 = vector.load %arg7[%c0_5, %c0_6] : memref<24x2048xf32, #tpu.memory_space<vmem>>, vector<24x2048xf32>
    %c0_7 = arith.constant 0 : index
    %c0_8 = arith.constant 0 : index
    %c0_9 = arith.constant 0 : index
    %5 = vector.load %arg2[%c0_7, %c0_8, %c0_9] : memref<5x24x24xf32, #tpu.memory_space<vmem>>, vector<1x24x24xf32>
    %6 = vector.shape_cast %5 : vector<1x24x24xf32> to vector<24x24xf32>
    %cst_10 = arith.constant dense<0.000000e+00> : vector<24x2048xf32>
    %7 = tpu.matmul %6, %4, %cst_10 {dimension_numbers = #tpu.dot_dimension_numbers<[1], [0], [0], [1], [0, 0, 1, 1], [], []>} : vector<24x24xf32>, vector<24x2048xf32>, vector<24x2048xf32> -> vector<24x2048xf32>
    %c0_11 = arith.constant 0 : index
    %c0_12 = arith.constant 0 : index
    %c0_13 = arith.constant 0 : index
    %8 = vector.load %arg3[%c0_11, %c0_12, %c0_13] : memref<5x24x1xf32, #tpu.memory_space<vmem>>, vector<1x24x1xf32>
    %9 = vector.shape_cast %8 : vector<1x24x1xf32> to vector<24x1xf32>
    %10 = vector.broadcast %9 : vector<24x1xf32> to vector<24x2048xf32>
    %11 = arith.addf %7, %10 : vector<24x2048xf32>
    %12 = math.tanh %11 : vector<24x2048xf32>
    %c1 = arith.constant 1 : index
    %c0_14 = arith.constant 0 : index
    %c0_15 = arith.constant 0 : index
    %13 = vector.load %arg2[%c1, %c0_14, %c0_15] : memref<5x24x24xf32, #tpu.memory_space<vmem>>, vector<1x24x24xf32>
    %14 = vector.shape_cast %13 : vector<1x24x24xf32> to vector<24x24xf32>
    %cst_16 = arith.constant dense<0.000000e+00> : vector<24x2048xf32>
    %15 = tpu.matmul %14, %12, %cst_16 {dimension_numbers = #tpu.dot_dimension_numbers<[1], [0], [0], [1], [0, 0, 1, 1], [], []>} : vector<24x24xf32>, vector<24x2048xf32>, vector<24x2048xf32> -> vector<24x2048xf32>
    %c1_17 = arith.constant 1 : index
    %c0_18 = arith.constant 0 : index
    %c0_19 = arith.constant 0 : index
    %16 = vector.load %arg3[%c1_17, %c0_18, %c0_19] : memref<5x24x1xf32, #tpu.memory_space<vmem>>, vector<1x24x1xf32>
    %17 = vector.shape_cast %16 : vector<1x24x1xf32> to vector<24x1xf32>
    %18 = vector.broadcast %17 : vector<24x1xf32> to vector<24x2048xf32>
    %19 = arith.addf %15, %18 : vector<24x2048xf32>
    %20 = math.tanh %19 : vector<24x2048xf32>
    %c2 = arith.constant 2 : index
    %c0_20 = arith.constant 0 : index
    %c0_21 = arith.constant 0 : index
    %21 = vector.load %arg2[%c2, %c0_20, %c0_21] : memref<5x24x24xf32, #tpu.memory_space<vmem>>, vector<1x24x24xf32>
    %22 = vector.shape_cast %21 : vector<1x24x24xf32> to vector<24x24xf32>
    %cst_22 = arith.constant dense<0.000000e+00> : vector<24x2048xf32>
    %23 = tpu.matmul %22, %20, %cst_22 {dimension_numbers = #tpu.dot_dimension_numbers<[1], [0], [0], [1], [0, 0, 1, 1], [], []>} : vector<24x24xf32>, vector<24x2048xf32>, vector<24x2048xf32> -> vector<24x2048xf32>
    %c2_23 = arith.constant 2 : index
    %c0_24 = arith.constant 0 : index
    %c0_25 = arith.constant 0 : index
    %24 = vector.load %arg3[%c2_23, %c0_24, %c0_25] : memref<5x24x1xf32, #tpu.memory_space<vmem>>, vector<1x24x1xf32>
    %25 = vector.shape_cast %24 : vector<1x24x1xf32> to vector<24x1xf32>
    %26 = vector.broadcast %25 : vector<24x1xf32> to vector<24x2048xf32>
    %27 = arith.addf %23, %26 : vector<24x2048xf32>
    %28 = math.tanh %27 : vector<24x2048xf32>
    %c3 = arith.constant 3 : index
    %c0_26 = arith.constant 0 : index
    %c0_27 = arith.constant 0 : index
    %29 = vector.load %arg2[%c3, %c0_26, %c0_27] : memref<5x24x24xf32, #tpu.memory_space<vmem>>, vector<1x24x24xf32>
    %30 = vector.shape_cast %29 : vector<1x24x24xf32> to vector<24x24xf32>
    %cst_28 = arith.constant dense<0.000000e+00> : vector<24x2048xf32>
    %31 = tpu.matmul %30, %28, %cst_28 {dimension_numbers = #tpu.dot_dimension_numbers<[1], [0], [0], [1], [0, 0, 1, 1], [], []>} : vector<24x24xf32>, vector<24x2048xf32>, vector<24x2048xf32> -> vector<24x2048xf32>
    %c3_29 = arith.constant 3 : index
    %c0_30 = arith.constant 0 : index
    %c0_31 = arith.constant 0 : index
    %32 = vector.load %arg3[%c3_29, %c0_30, %c0_31] : memref<5x24x1xf32, #tpu.memory_space<vmem>>, vector<1x24x1xf32>
    %33 = vector.shape_cast %32 : vector<1x24x1xf32> to vector<24x1xf32>
    %34 = vector.broadcast %33 : vector<24x1xf32> to vector<24x2048xf32>
    %35 = arith.addf %31, %34 : vector<24x2048xf32>
    %36 = math.tanh %35 : vector<24x2048xf32>
    %c4 = arith.constant 4 : index
    %c0_32 = arith.constant 0 : index
    %c0_33 = arith.constant 0 : index
    %37 = vector.load %arg2[%c4, %c0_32, %c0_33] : memref<5x24x24xf32, #tpu.memory_space<vmem>>, vector<1x24x24xf32>
    %38 = vector.shape_cast %37 : vector<1x24x24xf32> to vector<24x24xf32>
    %cst_34 = arith.constant dense<0.000000e+00> : vector<24x2048xf32>
    %39 = tpu.matmul %38, %36, %cst_34 {dimension_numbers = #tpu.dot_dimension_numbers<[1], [0], [0], [1], [0, 0, 1, 1], [], []>} : vector<24x24xf32>, vector<24x2048xf32>, vector<24x2048xf32> -> vector<24x2048xf32>
    %c4_35 = arith.constant 4 : index
    %c0_36 = arith.constant 0 : index
    %c0_37 = arith.constant 0 : index
    %40 = vector.load %arg3[%c4_35, %c0_36, %c0_37] : memref<5x24x1xf32, #tpu.memory_space<vmem>>, vector<1x24x1xf32>
    %41 = vector.shape_cast %40 : vector<1x24x1xf32> to vector<24x1xf32>
    %42 = vector.broadcast %41 : vector<24x1xf32> to vector<24x2048xf32>
    %43 = arith.addf %39, %42 : vector<24x2048xf32>
    %44 = math.tanh %43 : vector<24x2048xf32>
    %c0_38 = arith.constant 0 : index
    %c0_39 = arith.constant 0 : index
    %45 = vector.load %arg4[%c0_38, %c0_39] : memref<8x24xf32, #tpu.memory_space<vmem>>, vector<8x24xf32>
    %cst_40 = arith.constant dense<0.000000e+00> : vector<8x2048xf32>
    %46 = tpu.matmul %45, %44, %cst_40 {dimension_numbers = #tpu.dot_dimension_numbers<[1], [0], [0], [1], [0, 0, 1, 1], [], []>} : vector<8x24xf32>, vector<24x2048xf32>, vector<8x2048xf32> -> vector<8x2048xf32>
    %c0_41 = arith.constant 0 : index
    %c0_42 = arith.constant 0 : index
    %47 = vector.load %arg5[%c0_41, %c0_42] : memref<8x1xf32, #tpu.memory_space<vmem>>, vector<8x1xf32>
    %48 = vector.broadcast %47 : vector<8x1xf32> to vector<8x2048xf32>
    %49 = arith.addf %46, %48 : vector<8x2048xf32>
    %50 = vector.extract_strided_slice %49 {offsets = [0, 0], sizes = [3, 2048], strides = [1, 1]} : vector<8x2048xf32> to vector<3x2048xf32>
    %c0_43 = arith.constant 0 : index
    %c0_44 = arith.constant 0 : index
    %51 = vector.load %arg6[%c0_43, %c0_44] : memref<3x2048xf32, #tpu.memory_space<vmem>>, vector<3x2048xf32>
    tpu.vector_store %arg6[%c0_43, %c0_44], %50 {strides = array<i32>} : memref<3x2048xf32, #tpu.memory_space<vmem>>, vector<3x2048xf32>,
    return
  }
  func.func @transform_0(%arg0: i32) -> (i32, i32) {
    %c0_i32 = arith.constant 0 : i32
    %c0_i32_0 = arith.constant 0 : i32
    return %c0_i32, %arg0 : i32, i32
  }
  func.func @transform_1(%arg0: i32) -> (i32, i32, i32) {
    %c0_i32 = arith.constant 0 : i32
    %c0_i32_0 = arith.constant 0 : i32
    %c0_i32_1 = arith.constant 0 : i32
    %c0_i32_2 = arith.constant 0 : i32
    return %c0_i32, %c0_i32_0, %c0_i32_1 : i32, i32, i32
  }
  func.func @transform_2(%arg0: i32) -> (i32, i32, i32) {
    %c0_i32 = arith.constant 0 : i32
    %c0_i32_0 = arith.constant 0 : i32
    %c0_i32_1 = arith.constant 0 : i32
    %c0_i32_2 = arith.constant 0 : i32
    return %c0_i32, %c0_i32_0, %c0_i32_1 : i32, i32, i32
  }
  func.func @transform_3(%arg0: i32) -> (i32, i32) {
    %c0_i32 = arith.constant 0 : i32
    %c0_i32_0 = arith.constant 0 : i32
    %c0_i32_1 = arith.constant 0 : i32
    return %c0_i32, %c0_i32_0 : i32, i32
  }
  func.func @transform_4(%arg0: i32) -> (i32, i32) {
    %c0_i32 = arith.constant 0 : i32
    %c0_i32_0 = arith.constant 0 : i32
    %c0_i32_1 = arith.constant 0 : i32
    return %c0_i32, %c0_i32_0 : i32, i32
  }
  func.func @transform_5(%arg0: i32) -> (i32, i32) {
    %c0_i32 = arith.constant 0 : i32
    %c0_i32_0 = arith.constant 0 : i32
    return %c0_i32, %arg0 : i32, i32
  }
}

</mosaic_0001>

<bundles_post_ra>
// kernel: tpu_custom_call.1
= control target key start
LH: loop header
LB: loop body
LE: loop exit
PB: predicated region body
PF: predicated region fallthrough
CT: control target
= control target key end

     0   :  { %10 = vsyncpa [#allocation4], 0  ;;  %s6926_s0 = inlined_call_operand.hbm [shape: f32[2,4096], index: 0, kind: input, shape index: {}]   ;;  %s6927_s1 = inlined_call_operand.vmem [shape: f32[5,24,24], index: 1, kind: input, shape index: {}]   ;;  %s6928_s2 = inlined_call_operand.vmem [shape: f32[5,24,1], index: 2, kind: input, shape index: {}]   ;;  %s6929_s3 = inlined_call_operand.vmem [shape: f32[8,24], index: 3, kind: input, shape index: {}]   ;;  %s6930_s4 = inlined_call_operand.vmem [shape: f32[8,1], index: 4, kind: input, shape index: {}]   ;;  %s6931_s5 = inlined_call_operand.hbm [shape: f32[3,4096], index: 5, kind: output, shape index: {}]  }
   0x1   :  { %12 = vsyncpa [#allocation4 + $0x1], 0 }
   0x2   :  { %13 = vsyncpa [#allocation5], 0 }
   0x3   :  { %15 = vsyncpa [#allocation5 + $0x1], 0  ;;  %s5904_s18 = smov 0   ;;  %s5906_s19 = smov 0  }
   0x4   :  { %s5908_s20 = smov 0   ;;  %s5910_s21 = smov 0  }
   0x5 LB: > { %s5925_s22 = sadd.s32 4294967295, %s5867_s21   ;;  %s4869_s23 = sadd.s32 4294967294, %s5867_s21   ;;  %s5867_s21 = sphi %s5910_s21, %s6946_s21   ;;  %s5863_s20 = sphi %s5908_s20, %s6945_s20   ;;  %s5859_s19 = sphi %s5906_s19, %s6944_s19   ;;  %s5855_s18 = sphi %s5904_s18, %s6943_s18  }
   0x6   : > { %s5929_s24 = sadd.s32 1, %s5867_s21   ;;  %s28_s25 = sadd.s32 1, %s5863_s20 }
   0x7   : > { %s25_s26 = ssub.s32 %s5867_s21, %s5929_s24  ;;  %p35_p0 = scmp.ne.s32.totalorder %s5863_s20, %s5859_s19 }
   0x8   : > { %p26_p1 = scmp.eq.s32.totalorder %s25_s26, 0  ;;  %p36_p2 = scmp.eq.s32.totalorder %s5867_s21, 0 }
   0x9   : > { %p41_p3 = scmp.ne.s32.totalorder %s5859_s19, %s5855_s18  ;;  %p42_p4 = scmp.eq.s32.totalorder %s5925_s22, 0 }
   0xa   : > { %s5941_s27 = scalar_select %p26_p1, %s5863_s20, %s28_s25  }
   0xb   : > { %p5943_p5 = por %p36_p2, %p35_p0  ;;  %p5947_p6 = por %p42_p4, %p41_p3 }
   0xc   : > { %p149_p7 = scmp.eq.s32.totalorder %s5925_s22, 1  ;;  %p155_p8 = scmp.eq.s32.totalorder %s4869_s23, 1 }
   0xd   : > { %p5249_p10 = scmp.lt.s32.totalorder %s5867_s21, 2  ;;  %s187_s7 = sand.u32 1, %s5863_s20  }
   0xe   : > { %p5954_p11 = por %p149_p7, %p35_p0  ;;  %p5958_p12 = por %p155_p8, %p41_p3 }
   0xf   : > { %s5043_s8 = sshll.u32 %s5867_s21, 9  ;;  %s4872_s9 = sshll.u32 %s187_s7, 5 }
  0x10   : > { %s6935_s30 = scalar_select %p5954_p11, 1, 0 }
  0x11   : > { %s6936_s6 = scalar_select %p5958_p12, 1, 0 }
  0x12   : > { %s5967_s12 = scalar_lea.hbm %s6926_s0, %s5043_s8  ;;  %s191_s13 = scalar_lea.vmem [#allocation3], %s4872_s9 }
  0x13   : > { %s199_s14 = sshll.u32 %s191_s13, 4  ;;  %p5971_p13 = pnand %p5249_p10, %p5943_p5  ;;  %s5975_s14 = int_to_ptr.vmem [resolvable:$true] %s199_s14 }
  0x14   : > { %s188_s16 = scalar_lea.sflag [#allocation4], %s187_s7  ;;  %s5771_s17 = scalar_lea.hbm %s5967_s12, 512 }
  0x15   : > { %p5772_p2 = scmp.ne.s32.totalorder %s5967_s12, %s5771_s17  ;;  %p5773_p3 = pneg %p5971_p13 }
  0x16   : > { %s5776_s26 = scalar_lea.hbm %s6926_s0, 1024  ;;  %p5777_p5 = scmp.lt.u32.totalorder %s5967_s12, %s6926_s0 }
  0x17   : > { %p5774_p4 = pnand %p5773_p3, %p5772_p2  ;;  %p5778_p8 = scmp.lt.u32.totalorder %s5776_s26, %s5771_s17 }
  0x18   : > { %p5780_p9 = scmp.lt.u32.totalorder %s5771_s17, %s5967_s12 }
  0x19   : > { %p5775_p7 = pneg %p5774_p4  ;;  %p5779_p10 = por %p5778_p8, %p5777_p5 }
  0x1b   : > { %p5781_p0 = por %p5780_p9, %p5779_p10 }
  0x1d   : > { %p5782_p1 = pnand %p5781_p0, %p5775_p7 }
  0x1f   : > { %5785 = shalt.err (!%p5782_p1)
}
  0x20   : > { %s5786_s7 = scalar_lea.vmem %s5975_s14, 512  ;;  %s5869_s9 = smov [#allocation3]  }
  0x21   : > { %p5787_p2 = scmp.ne.s32.totalorder %s5975_s14, %s5786_s7  ;;  %s5791_s10 = sshll.u32 %s5869_s9, 4  ;;  %s5792_s10 = int_to_ptr.vmem [resolvable:$false] %s5791_s10 }
  0x22   : > { %s5793_s11 = scalar_lea.vmem %s5792_s10, 1024  ;;  %p5794_p11 = scmp.lt.s32.totalorder %s5975_s14, %s5792_s10 }
  0x23   : > { %p5789_p4 = pnand %p5787_p2, %p5773_p3  ;;  %p5795_p5 = scmp.lt.s32.totalorder %s5793_s11, %s5786_s7 }
  0x25   : > { %p5790_p12 = pneg %p5789_p4  ;;  %p5796_p8 = por %p5795_p5, %p5794_p11 }
  0x27   : > { %p5797_p9 = pnand %p5796_p8, %p5790_p12 }
  0x29   : > { %5800 = shalt.err (!%p5797_p9)
}
  0x2a   : > { %5244 = dma.hbm_to_vmem [thread:$0]  (!%p5971_p13), %s5967_s12, 512, %s5975_s14, %s188_s16  }
  0x2b   : > { %p6938_p0 = scmp.lt.s32.totalorder %s5867_s21, 3  ;;  %p6939_p1 = scmp.ge.s32.totalorder %s5867_s21, 1 }
  0x2d   : > { %p205_p3 = pnand %p6939_p1, %p6938_p0 }
  0x2e   : > { %s6009_s13 = sand.u32 (!%p205_p3), 1, %s5859_s19  }
  0x2f   : > { %208 = sbr.rel (%p205_p3) target bundleno = 1546 (0x60a), region = 40  ;;  %s4876_s17 = sshll.u32 (!%p205_p3), %s6009_s13, 5 }
  0x30   : > { %s211_s23 = scalar_lea.sflag (!%p205_p3), [#allocation4], %s6009_s13  ;;  %s6013_s25 = scalar_lea.vmem (!%p205_p3), [#allocation3], %s4876_s17 }
  0x36   : > { %5846 = dma.done.wait (%p5947_p6), %s211_s23, 512  }
  0x37   : > { %5848 = vsyncadd (%p5947_p6), %s211_s23, 4294966784  ;;  %v303_v0 = vlaneseq  ;;  %v5870_v1 = vmov 0.0   ;;  %v5871_v2 = vmov 1983009808   ;;  %v5872_v5 = vmov 0   ;;  %v291_v8 = vld [vmem:[%s6013_s25] sm:$0xff] }
  0x38   : > { %244 = vst [vmem:[#allocation2 + $0x8] sm:$0xff] %v5870_v1  ;;  %260 = vst [vmem:[#allocation2 + $0x88] sm:$0xff] %v5870_v1  ;;  %v301_v3 = vunpack.c.l.s4 %v5871_v2  ;;  %542 = vmatprep.mubr.f32.mxu0 %v5870_v1  ;;  %625 = vmatprep.mubr.f32.mxu1 %v5870_v1  ;;  %v299_v10 = vcombine.high %v291_v8, %v291_v8  ;;  %v292_v11 = vld [vmem:[%s6013_s25 + $0x8] sm:$0xff]  ;;  %v293_v12 = vld [vmem:[%s6013_s25 + $0x10] sm:$0xff]  ;;  %vm468_vm0 = vcmask 195584   ;;  %s4877_s16 = sshll.u32 %s6009_s13, 6 }
  0x39   : > { %243 = vst [vmem:[#allocation2] sm:$0xff] %v5870_v1  ;;  %245 = vst [vmem:[#allocation2 + $0x10] sm:$0xff] %v5870_v1  ;;  %v304_v4 = vshrl.u32 %v303_v0, 7  ;;  %5286 = vset.pattern.permute.xlu0 %v5872_v5  ;;  %5287 = vset.pattern.permute.xlu1 %v5872_v5  ;;  %v316_v14 = vcombine.high %v292_v11, %v292_v11  ;;  %v333_v16 = vcombine.high %v293_v12, %v293_v12  ;;  %v294_v17 = vld [vmem:[%s6013_s25 + $0x18] sm:$0xff]  ;;  %v450_v18 = vld [vmem:[%s6928_s2] sm:$0xff]  ;;  %s6867_s26 = scalar_lea.vmem [#allocation6], %s4877_s16 }
  0x3a   : > { %246 = vst [vmem:[#allocation2 + $0x18] sm:$0xff] %v5870_v1  ;;  %247 = vst [vmem:[#allocation2 + $0x20] sm:$0xff] %v5870_v1  ;;  %v302_v6 = vunpack.c.0.s8 %v301_v3  ;;  %v350_v22 = vcombine.high %v294_v17, %v294_v17  ;;  %455 = vperm.xlu0 %5286, %v450_v18   ;;  %v452_v23 = vld [vmem:[%s6928_s2 + $0x10] sm:$0xff]  ;;  %v451_v28 = vld [vmem:[%s6928_s2 + $0x8] sm:$0xff]  ;;  %s5044_s28 = sshll.u32 %s5925_s22, 10  ;;  %s4799_s8 = sshll.u32 %s6867_s26, 4  ;;  %s6883_s8 = int_to_ptr.vmem [resolvable:$true] %s4799_s8 }
  0x3b   : > { %248 = vst [vmem:[#allocation2 + $0x28] sm:$0xff] %v5870_v1  ;;  %249 = vst [vmem:[#allocation2 + $0x30] sm:$0xff] %v5870_v1  ;;  %465 = vperm.xlu1 %5287, %v452_v23   ;;  %v4913_v32 = vld [vmem:[%s6928_s2 + $0x18] sm:$0xff]  ;;  %v4914_v36 = vld [vmem:[%s6928_s2 + $0x20] sm:$0xff]  ;;  %s6881_s10 = scalar_lea.hbm %s6931_s5, %s5044_s28  ;;  %s4785_s11 = scalar_lea.sflag [#allocation5], %s6009_s13 }
  0x3c   : > { %250 = vst [vmem:[#allocation2 + $0x38] sm:$0xff] %v5870_v1  ;;  %251 = vst [vmem:[#allocation2 + $0x40] sm:$0xff] %v5870_v1  ;;  %v305_v7 = vsub.s32 %v302_v6, %v304_v4  ;;  %v4915_v38 = vld [vmem:[%s6928_s2 + $0x28] sm:$0xff]  ;;  %v4943_v42 = vld [vmem:[%s6928_s2 + $0x30] sm:$0xff]  ;;  %s5801_s17 = scalar_lea.vmem %s6883_s8, 1024  ;;  %p6940_p11 = scmp.ne.s32.totalorder %s6935_s30, 0 }
  0x3d   : > { %252 = vst [vmem:[#allocation2 + $0x48] sm:$0xff] %v5870_v1  ;;  %253 = vst [vmem:[#allocation2 + $0x50] sm:$0xff] %v5870_v1  ;;  %v4944_v44 = vld [vmem:[%s6928_s2 + $0x38] sm:$0xff]  ;;  %v4945_v50 = vld [vmem:[%s6928_s2 + $0x40] sm:$0xff]  ;;  %p5802_p6 = scmp.ne.s32.totalorder %s6883_s8, %s5801_s17  ;;  %s5873_s22 = smov [#allocation6]  }
  0x3e   : > { %254 = vst [vmem:[#allocation2 + $0x58] sm:$0xff] %v5870_v1  ;;  %255 = vst [vmem:[#allocation2 + $0x60] sm:$0xff] %v5870_v1  ;;  %v306_v9 = vrot.slane %v291_v8, %v305_v7  ;;  %v323_v13 = vrot.slane %v292_v11, %v305_v7  ;;  %v340_v15 = vrot.slane %v293_v12, %v305_v7  ;;  %460 = vperm.xlu0 %5286, %v451_v28   ;;  %v4973_v53 = vld [vmem:[%s6928_s2 + $0x48] sm:$0xff]  ;;  %v6081_v54 = vld [vmem:[%s6927_s1] sm:$0xff]  ;;  %s5805_s23 = sshll.u32 %s5873_s22, 4  ;;  %s5806_s23 = int_to_ptr.vmem [resolvable:$false] %s5805_s23 }
  0x3f   : > { %256 = vst [vmem:[#allocation2 + $0x68] sm:$0xff] %v5870_v1  ;;  %257 = vst [vmem:[#allocation2 + $0x70] sm:$0xff] %v5870_v1  ;;  %v313_v20 = vrot.slane %v299_v10, %v305_v7  ;;  %v357_v21 = vrot.slane %v294_v17, %v305_v7  ;;  %v330_v25 = vrot.slane %v316_v14, %v305_v7  ;;  %1200 = vperm.xlu1 %5287, %v4913_v32   ;;  %v6095_v59 = vld [vmem:[%s6927_s1 + $0x8] sm:$0xff]  ;;  %v6106_v62 = vld [vmem:[%s6927_s1 + $0x10] sm:$0xff]  ;;  %p5803_p12 = pnand %p5802_p6, %p6940_p11  ;;  %s5807_s25 = scalar_lea.vmem %s5806_s23, 2048 }
  0x40   : > { %258 = vst [vmem:[#allocation2 + $0x78] sm:$0xff] %v5870_v1  ;;  %4878 = vst.sshfl [vmem:[#allocation2] sm:$0x3 pattern:$0x76325410] %v291_v8  ;;  %v314_v19 = vcombine.high %v306_v9, %v306_v9  ;;  %v331_v24 = vcombine.high %v323_v13, %v323_v13  ;;  %v348_v26 = vcombine.high %v340_v15, %v340_v15  ;;  %v4974_v4 = vld [vmem:[%s6928_s2 + $0x50] sm:$0xff]  ;;  %p5808_p7 = scmp.lt.s32.totalorder %s6883_s8, %s5806_s23  ;;  %p5809_p10 = scmp.lt.s32.totalorder %s5807_s25, %s5801_s17 }
  0x41   : > { %4880 = vst.sshfl [vmem:[#allocation2 + $0x20] sm:$0x3 pattern:$0x76325410] %v292_v11  ;;  %v347_v27 = vrot.slane %v333_v16, %v305_v7  ;;  %v315_v29 = vcombine.high %v313_v20, %v313_v20  ;;  %v365_v30 = vcombine.high %v357_v21, %v357_v21  ;;  %v364_v31 = vrot.slane %v350_v22, %v305_v7  ;;  %v4975_v6 = vld [vmem:[%s6928_s2 + $0x58] sm:$0xff]  ;;  %v5003_v13 = vld [vmem:[%s6928_s2 + $0x60] sm:$0xff]  ;;  %p5804_p13 = pneg %p5803_p12 }
  0x42   : > { %4882 = vst.sshfl [vmem:[#allocation2 + $0x40] sm:$0x3 pattern:$0x76325410] %v293_v12  ;;  %384 = vst [vmem:[#allocation2 + $0x8] sm:$0x3] %v314_v19  ;;  %v332_v33 = vcombine.high %v330_v25, %v330_v25  ;;  %1205 = vperm.xlu0 %5286, %v4914_v36   ;;  %p5810_p2 = por %p5809_p10, %p5808_p7 }
  0x43   : > { %4879 = vst.sshfl [vmem:[#allocation2 + $0x10] sm:$0x3 pattern:$0x76325410] %v299_v10  ;;  %388 = vst [vmem:[#allocation2 + $0x28] sm:$0x3] %v331_v24  ;;  %v349_v34 = vcombine.high %v347_v27, %v347_v27  ;;  %v366_v35 = vcombine.high %v364_v31, %v364_v31  ;;  %1210 = vperm.xlu1 %5287, %v4915_v38  }
  0x44   : > { %4884 = vst.sshfl [vmem:[#allocation2 + $0x60] sm:$0x3 pattern:$0x76325410] %v294_v17  ;;  %392 = vst [vmem:[#allocation2 + $0x48] sm:$0x3] %v348_v26  ;;  %p5811_p4 = pnand %p5810_p2, %p5804_p13 }
  0x45   : > { %4881 = vst.sshfl [vmem:[#allocation2 + $0x30] sm:$0x3 pattern:$0x76325410] %v316_v14  ;;  %386 = vst [vmem:[#allocation2 + $0x18] sm:$0x3] %v315_v29 }
  0x46   : > { %4883 = vst.sshfl [vmem:[#allocation2 + $0x50] sm:$0x3 pattern:$0x76325410] %v333_v16  ;;  %396 = vst [vmem:[#allocation2 + $0x68] sm:$0x3] %v365_v30  ;;  %1944 = vperm.xlu0 %5286, %v4943_v42  }
  0x47   : > { %4885 = vst.sshfl [vmem:[#allocation2 + $0x70] sm:$0x3 pattern:$0x76325410] %v350_v22  ;;  %390 = vst [vmem:[#allocation2 + $0x38] sm:$0x3] %v332_v33  ;;  %1949 = vperm.xlu1 %5287, %v4944_v44  }
  0x48   : > { %394 = vst [vmem:[#allocation2 + $0x58] sm:$0x3] %v349_v34  ;;  %v399_v37 = vld [vmem:[#allocation2] sm:$0xff]  ;;  %398 = vst [vmem:[#allocation2 + $0x78] sm:$0x3] %v366_v35  ;;  %v5004_v14 = vld [vmem:[%s6928_s2 + $0x68] sm:$0xff] }
  0x49   : > { %v400_v40 = vld [vmem:[#allocation2 + $0x8] sm:$0xff]  ;;  %v5047_v41 = vpack.c.bf16 %v5870_v1, %v399_v37  ;;  %v403_v49 = vld [vmem:[#allocation2 + $0x20] sm:$0xff]  ;;  %v5005_v18 = vld [vmem:[%s6928_s2 + $0x70] sm:$0xff] }
  0x4a   : > { %v401_v39 = vld [vmem:[#allocation2 + $0x10] sm:$0xff]  ;;  %v5045_v43 = vpack.c.bf16 %v5870_v1, %v400_v40  ;;  %v404_v47 = vld [vmem:[#allocation2 + $0x28] sm:$0xff]  ;;  %v5055_v56 = vpack.c.bf16 %v5870_v1, %v403_v49  ;;  %1954 = vperm.xlu0 %5286, %v4945_v50   ;;  %v407_v0 = vld [vmem:[#allocation2 + $0x40] sm:$0xff] }
  0x4b   : > { %v5051_v46 = vpack.c.bf16 %v5870_v1, %v401_v39  ;;  %v5053_v51 = vpack.c.bf16 %v5870_v1, %v404_v47  ;;  %2688 = vperm.xlu1 %5287, %v4973_v53   ;;  %v408_v60 = vld [vmem:[#allocation2 + $0x48] sm:$0xff]  ;;  %v5063_v5 = vpack.c.bf16 %v5870_v1, %v407_v0  ;;  %v411_v12 = vld [vmem:[#allocation2 + $0x60] sm:$0xff] }
  0x4c   : > { %v402_v45 = vld [vmem:[#allocation2 + $0x18] sm:$0xff]  ;;  %5046 = vmatprep.subr.bf16.mxu0 %v5045_v43  ;;  %v405_v55 = vld [vmem:[#allocation2 + $0x30] sm:$0xff]  ;;  %v5061_v63 = vpack.c.bf16 %v5870_v1, %v408_v60  ;;  %v5071_v16 = vpack.c.bf16 %v5870_v1, %v411_v12  ;;  %v4167_v19 = vld [vmem:[%s6930_s4] sm:$0xff] }
  0x4d   : > { %v5049_v48 = vpack.c.bf16 %v5870_v1, %v402_v45  ;;  %5048 = vmatpush1.bf16.msra.mxu0 %v5047_v41  ;;  %v5059_v58 = vpack.c.bf16 %v5870_v1, %v405_v55  ;;  %v409_v3 = vld [vmem:[#allocation2 + $0x50] sm:$0xff]  ;;  %v412_v8 = vld [vmem:[#allocation2 + $0x68] sm:$0xff] }
  0x4e   : > { %482 = vmatprep.subr.mxu0 %v5870_v1  ;;  %v406_v52 = vld [vmem:[#allocation2 + $0x38] sm:$0xff]  ;;  %v5067_v7 = vpack.c.bf16 %v5870_v1, %v409_v3  ;;  %2693 = vperm.xlu0 %5286, %v4974_v4   ;;  %v5069_v10 = vpack.c.bf16 %v5870_v1, %v412_v8  ;;  %v413_v15 = vld [vmem:[#allocation2 + $0x70] sm:$0xff] }
  0x4f   : > { %5050 = vmatprep.subr.bf16.mxu1 %v5049_v48  ;;  %v5057_v57 = vpack.c.bf16 %v5870_v1, %v406_v52  ;;  %v410_v61 = vld [vmem:[#allocation2 + $0x58] sm:$0xff]  ;;  %2698 = vperm.xlu1 %5287, %v4975_v6   ;;  %v5075_v17 = vpack.c.bf16 %v5870_v1, %v413_v15 }
  0x50   : > { %5052 = vmatpush1.bf16.msra.mxu1 %v5051_v46  ;;  %v5065_v2 = vpack.c.bf16 %v5870_v1, %v410_v61  ;;  %v414_v9 = vld [vmem:[#allocation2 + $0x78] sm:$0xff] }
  0x51   : > { %565 = vmatprep.subr.mxu1 %v5870_v1  ;;  %483 = vmatpush1.msra.mxu0 %v5870_v1  ;;  %v5073_v11 = vpack.c.bf16 %v5870_v1, %v414_v9 }
  0x52   : > { %4886 = vmatmul.mubr.msk.f32.vlgmr.msra.gmra.mrb[0].mxu0 %vm468_vm0, %v6081_v54  ;;  %5054 = vmatprep.subr.bf16.mxu0 %v5053_v51 }
  0x53   : > { %548 = vmatprep.mubr.f32.mxu0 %v5870_v1  ;;  %5056 = vmatpush1.bf16.msra.mxu0 %v5055_v56 }
  0x54   : > { %566 = vmatpush1.msra.mxu1 %v5870_v1  ;;  %648 = vmatprep.subr.mxu0 %v5870_v1 }
  0x55   : > { %4889 = vmatmul.mubr.msk.f32.vlgmr.msra.gmra.mrb[0].mxu1 %vm468_vm0, %v6081_v54  ;;  %5058 = vmatprep.subr.bf16.mxu1 %v5057_v57 }
  0x56   : > { %631 = vmatprep.mubr.f32.mxu1 %v5870_v1  ;;  %4887 = vmatmul.mubr.msk.f32.gmra.mrb[2].mxu0 %vm468_vm0, %v6095_v59 }
  0x57   : > { %5060 = vmatpush1.bf16.msra.mxu1 %v5059_v58  ;;  %554 = vmatprep.mubr.f32.mxu0 %v5870_v1 }
  0x58   : > { %649 = vmatpush1.msra.mxu0 %v5870_v1  ;;  %731 = vmatprep.subr.mxu1 %v5870_v1 }
  0x59   : > { %4890 = vmatmul.mubr.msk.f32.gmra.mrb[2].mxu1 %vm468_vm0, %v6095_v59  ;;  %5062 = vmatprep.subr.bf16.mxu0 %v5061_v63 }
  0x5a   : > { %637 = vmatprep.mubr.f32.mxu1 %v5870_v1  ;;  %4888 = vmatmul.mubr.msk.f32.gmra.mrb[4].mxu0 %vm468_vm0, %v6106_v62 }
  0x5b   : > { %732 = vmatpush1.msra.mxu1 %v5870_v1  ;;  %708 = vmatprep.mubr.f32.mxu0 %v5870_v1 }
  0x5c   : > { %5066 = vmatprep.subr.bf16.mxu1 %v5065_v2  ;;  %3432 = vperm.xlu0 %5286, %v5003_v13  }
  0x5d   : > { %4891 = vmatmul.mubr.msk.f32.gmra.mrb[4].mxu1 %vm468_vm0, %v6106_v62  ;;  %3437 = vperm.xlu1 %5287, %v5004_v14  }
  0x5e   : > { %791 = vmatprep.mubr.f32.mxu1 %v5870_v1  ;;  %4892 = vmatmul.mubr.msk.f32.vlgmr.msra.gmra.mrb[6].mxu0 %vm468_vm0, %v6081_v54 }
  0x5f   : > { %714 = vmatprep.mubr.f32.mxu0 %v5870_v1  ;;  %5064 = vmatpush1.bf16.msra.mxu0 %v5063_v5 }
  0x60   : > { %814 = vmatprep.subr.mxu0 %v5870_v1  ;;  %3442 = vperm.xlu0 %5286, %v5005_v18  }
  0x61   : > { %4895 = vmatmul.mubr.msk.f32.vlgmr.msra.gmra.mrb[6].mxu1 %vm468_vm0, %v6081_v54  ;;  %4170 = vperm.xlu1 %5287, %v4167_v19  }
  0x62   : > { %797 = vmatprep.mubr.f32.mxu1 %v5870_v1  ;;  %5068 = vmatpush1.bf16.msra.mxu1 %v5067_v7 }
  0x63   : > { %4893 = vmatmul.mubr.msk.f32.gmra.mrb[8].mxu0 %vm468_vm0, %v6095_v59  ;;  %897 = vmatprep.subr.mxu1 %v5870_v1 }
  0x64   : > { %720 = vmatprep.mubr.f32.mxu0 %v5870_v1  ;;  %815 = vmatpush1.msra.mxu0 %v5870_v1 }
  0x65   : > { %4896 = vmatmul.mubr.msk.f32.gmra.mrb[8].mxu1 %vm468_vm0, %v6095_v59  ;;  %5070 = vmatprep.subr.bf16.mxu0 %v5069_v10 }
  0x66   : > { %803 = vmatprep.mubr.f32.mxu1 %v5870_v1  ;;  %898 = vmatpush1.msra.mxu1 %v5870_v1 }
  0x67   : > { %4894 = vmatmul.mubr.msk.f32.gmra.mrb[10].mxu0 %vm468_vm0, %v6106_v62  ;;  %5074 = vmatprep.subr.bf16.mxu1 %v5073_v11 }
  0x68   : > { %874 = vmatprep.mubr.f32.mxu0 %v5870_v1 }
  0x69   : > { %4897 = vmatmul.mubr.msk.f32.gmra.mrb[10].mxu1 %vm468_vm0, %v6106_v62 }
  0x6a   : > { %957 = vmatprep.mubr.f32.mxu1 %v5870_v1 }
  0x6b   : > { %4898 = vmatmul.mubr.msk.f32.vlgmr.msra.gmra.mrb[12].mxu0 %vm468_vm0, %v6081_v54 }
  0x6c   : > { %880 = vmatprep.mubr.f32.mxu0 %v5870_v1  ;;  %5072 = vmatpush1.bf16.msra.mxu0 %v5071_v16 }
  0x6d   : > { %4901 = vmatmul.mubr.msk.f32.vlgmr.msra.gmra.mrb[12].mxu1 %vm468_vm0, %v6081_v54  ;;  %980 = vmatprep.subr.mxu0 %v5870_v1 }
  0x6e   : > { %963 = vmatprep.mubr.f32.mxu1 %v5870_v1  ;;  %5076 = vmatpush1.bf16.msra.mxu1 %v5075_v17 }
  0x6f   : > { %4899 = vmatmul.mubr.msk.f32.gmra.mrb[14].mxu0 %vm468_vm0, %v6095_v59  ;;  %1063 = vmatprep.subr.mxu1 %v5870_v1 }
  0x70   : > { %886 = vmatprep.mubr.f32.mxu0 %v5870_v1  ;;  %981 = vmatpush1.msra.mxu0 %v5870_v1 }
  0x71   : > { %4902 = vmatmul.mubr.msk.f32.gmra.mrb[14].mxu1 %vm468_vm0, %v6095_v59 }
  0x72   : > { %969 = vmatprep.mubr.f32.mxu1 %v5870_v1  ;;  %1064 = vmatpush1.msra.mxu1 %v5870_v1 }
  0x73   : > { %4900 = vmatmul.mubr.msk.f32.gmra.mrb[16].mxu0 %vm468_vm0, %v6106_v62 }
  0x74   : > { %1040 = vmatprep.mubr.f32.mxu0 %v5870_v1 }
  0x75   : > { %4903 = vmatmul.mubr.msk.f32.gmra.mrb[16].mxu1 %vm468_vm0, %v6106_v62 }
  0x76   : > { %1123 = vmatprep.mubr.f32.mxu1 %v5870_v1 }
  0x77   : > { %4904 = vmatmul.mubr.msk.f32.vlgmr.msra.gmra.mrb[18].mxu0 %vm468_vm0, %v6081_v54 }
  0x78   : > { %1046 = vmatprep.mubr.f32.mxu0 %v5870_v1 }
  0x79   : > { %4907 = vmatmul.mubr.msk.f32.vlgmr.msra.gmra.mrb[18].mxu1 %vm468_vm0, %v6081_v54 }
  0x7a   : > { %1129 = vmatprep.mubr.f32.mxu1 %v5870_v1 }
  0x7b   : > { %4905 = vmatmul.mubr.msk.f32.gmra.mrb[20].mxu0 %vm468_vm0, %v6095_v59 }
  0x7c   : > { %1052 = vmatprep.mubr.f32.mxu0 %v5870_v1 }
  0x7d   : > { %4908 = vmatmul.mubr.msk.f32.gmra.mrb[20].mxu1 %vm468_vm0, %v6095_v59 }
  0x7e   : > { %1135 = vmatprep.mubr.f32.mxu1 %v5870_v1 }
  0x7f   : > { %4906 = vmatmul.mubr.msk.f32.gmra.mrb[22].mxu0 %vm468_vm0, %v6106_v62 }
  0x80   : > { %1286 = vmatprep.mubr.f32.mxu0 %v5870_v1 }
  0x81   : > { %4909 = vmatmul.mubr.msk.f32.gmra.mrb[22].mxu1 %vm468_vm0, %v6106_v62 }
  0x82   : > { %1369 = vmatprep.mubr.f32.mxu1 %v5870_v1 }
  0xb9   : > { %v6209_v20 = vpop.permute.xlu0 %455 }
  0xba   : > { %v6220_v37 = vpop.permute.xlu1 %465 }
  0xbd   : > { %v6214_v28 = vpop.permute.xlu0 %460 }
 0x125   : > { %v544_v21 = vpop.f32.mrb[0].mxu0 }
 0x126   : > { %v545_v22 = vadd.f32 %v544_v21, %v6209_v20  ;;  %v546_v23 = vpop.f32.mrb[1].mxu0 }
 0x127   : > { %v547_v24 = vadd.f32 %v546_v23, %v6209_v20 }
 0x128   : > { %v627_v25 = vpop.f32.mrb[0].mxu1  ;;  %5288 = vtanh.f32 %v545_v22 }
 0x129   : > { %v628_v26 = vadd.f32 %v627_v25, %v6209_v20  ;;  %v629_v27 = vpop.f32.mrb[1].mxu1  ;;  %5290 = vtanh.f32 %v547_v24  ;;  %v550_v30 = vpop.f32.mrb[2].mxu0 }
 0x12a   : > { %v630_v29 = vadd.f32 %v629_v27, %v6209_v20  ;;  %v551_v31 = vadd.f32 %v550_v30, %v6214_v28  ;;  %v552_v32 = vpop.f32.mrb[3].mxu0 }
 0x12b   : > { %5292 = vtanh.f32 %v628_v26  ;;  %v553_v33 = vadd.f32 %v552_v32, %v6214_v28  ;;  %v6242_v26 = vld [vmem:[%s6927_s1 + $0x18] sm:$0xff] }
 0x12c   : > { %5294 = vtanh.f32 %v630_v29  ;;  %v633_v34 = vpop.f32.mrb[2].mxu1 }
 0x12d   : > { %5296 = vtanh.f32 %v551_v31  ;;  %v634_v35 = vadd.f32 %v633_v34, %v6214_v28  ;;  %v635_v36 = vpop.f32.mrb[3].mxu1  ;;  %v556_v39 = vpop.f32.mrb[4].mxu0 }
 0x12e   : > { %5298 = vtanh.f32 %v553_v33  ;;  %v636_v38 = vadd.f32 %v635_v36, %v6214_v28  ;;  %v557_v40 = vadd.f32 %v556_v39, %v6220_v37  ;;  %v558_v41 = vpop.f32.mrb[5].mxu0 }
 0x12f   : > { %5300 = vtanh.f32 %v634_v35  ;;  %v559_v42 = vadd.f32 %v558_v41, %v6220_v37  ;;  %v6256_v41 = vld [vmem:[%s6927_s1 + $0x20] sm:$0xff] }
 0x130   : > { %5302 = vtanh.f32 %v636_v38  ;;  %v639_v43 = vpop.f32.mrb[4].mxu1 }
 0x131   : > { %5304 = vtanh.f32 %v557_v40  ;;  %v640_v44 = vadd.f32 %v639_v43, %v6220_v37  ;;  %v641_v45 = vpop.f32.mrb[5].mxu1  ;;  %v710_v47 = vpop.f32.mrb[6].mxu0 }
 0x132   : > { %5306 = vtanh.f32 %v559_v42  ;;  %v642_v46 = vadd.f32 %v641_v45, %v6220_v37  ;;  %v5289_v48 = vpop.eup %5288  ;;  %v711_v49 = vadd.f32 %v710_v47, %v6209_v20  ;;  %v712_v50 = vpop.f32.mrb[7].mxu0 }
 0x133   : > { %5308 = vtanh.f32 %v640_v44  ;;  %v5291_v51 = vpop.eup %5290  ;;  %v713_v52 = vadd.f32 %v712_v50, %v6209_v20 }
 0x134   : > { %5310 = vtanh.f32 %v642_v46  ;;  %v793_v53 = vpop.f32.mrb[6].mxu1 }
 0x135   : > { %v5293_v54 = vpop.eup %5292  ;;  %5312 = vtanh.f32 %v711_v49  ;;  %v794_v55 = vadd.f32 %v793_v53, %v6209_v20  ;;  %v795_v56 = vpop.f32.mrb[7].mxu1 }
 0x136   : > { %v5295_v57 = vpop.eup %5294  ;;  %5314 = vtanh.f32 %v713_v52  ;;  %v796_v58 = vadd.f32 %v795_v56, %v6209_v20  ;;  %v716_v59 = vpop.f32.mrb[8].mxu0  ;;  %v6271_v56 = vld [vmem:[%s6927_s1 + $0x28] sm:$0xff] }
 0x137   : > { %v5297_v60 = vpop.eup %5296  ;;  %5316 = vtanh.f32 %v794_v55  ;;  %v717_v61 = vadd.f32 %v716_v59, %v6214_v28  ;;  %v718_v62 = vpop.f32.mrb[9].mxu0 }
 0x138   : > { %v5299_v63 = vpop.eup %5298  ;;  %5318 = vtanh.f32 %v796_v58  ;;  %v719_v0 = vadd.f32 %v718_v62, %v6214_v28  ;;  %v799_v2 = vpop.f32.mrb[8].mxu1  ;;  %v5079_v3 = vpack.c.bf16 %v5297_v60, %v5289_v48 }
 0x139   : > { %v5301_v4 = vpop.eup %5300  ;;  %5320 = vtanh.f32 %v717_v61  ;;  %v800_v5 = vadd.f32 %v799_v2, %v6214_v28  ;;  %v801_v6 = vpop.f32.mrb[9].mxu1  ;;  %v5077_v7 = vpack.c.bf16 %v5299_v63, %v5291_v51 }
 0x13a   : > { %v5303_v8 = vpop.eup %5302  ;;  %5322 = vtanh.f32 %v719_v0  ;;  %v802_v9 = vadd.f32 %v801_v6, %v6214_v28  ;;  %v722_v10 = vpop.f32.mrb[10].mxu0  ;;  %v5083_v11 = vpack.c.bf16 %v5301_v4, %v5293_v54 }
 0x13b   : > { %v5305_v12 = vpop.eup %5304  ;;  %5324 = vtanh.f32 %v800_v5  ;;  %v723_v13 = vadd.f32 %v722_v10, %v6220_v37  ;;  %v724_v14 = vpop.f32.mrb[11].mxu0  ;;  %5078 = vmatprep.subr.bf16.mxu0 %v5077_v7  ;;  %v5081_v15 = vpack.c.bf16 %v5303_v8, %v5295_v57 }
 0x13c   : > { %v5307_v16 = vpop.eup %5306  ;;  %5326 = vtanh.f32 %v802_v9  ;;  %v725_v17 = vadd.f32 %v724_v14, %v6220_v37  ;;  %v805_v18 = vpop.f32.mrb[10].mxu1  ;;  %5080 = vmatpush1.bf16.msra.mxu0 %v5079_v3 }
 0x13d   : > { %v5309_v19 = vpop.eup %5308  ;;  %5328 = vtanh.f32 %v723_v13  ;;  %v806_v21 = vadd.f32 %v805_v18, %v6220_v37  ;;  %v807_v22 = vpop.f32.mrb[11].mxu1  ;;  %5082 = vmatprep.subr.bf16.mxu1 %v5081_v15  ;;  %1226 = vmatprep.subr.mxu0 %v5307_v16 }
 0x13e   : > { %v5311_v23 = vpop.eup %5310  ;;  %5330 = vtanh.f32 %v725_v17  ;;  %v808_v24 = vadd.f32 %v807_v22, %v6220_v37  ;;  %v876_v25 = vpop.f32.mrb[12].mxu0  ;;  %5084 = vmatpush1.bf16.msra.mxu1 %v5083_v11 }
 0x13f   : > { %v5313_v27 = vpop.eup %5312  ;;  %5332 = vtanh.f32 %v806_v21  ;;  %v877_v29 = vadd.f32 %v876_v25, %v6209_v20  ;;  %v878_v30 = vpop.f32.mrb[13].mxu0  ;;  %1309 = vmatprep.subr.mxu1 %v5311_v23 }
 0x140   : > { %v5315_v31 = vpop.eup %5314  ;;  %5334 = vtanh.f32 %v808_v24  ;;  %v879_v32 = vadd.f32 %v878_v30, %v6209_v20  ;;  %v959_v33 = vpop.f32.mrb[12].mxu1  ;;  %1227 = vmatpush1.msra.mxu0 %v5305_v12 }
 0x141   : > { %v6246_v34 = vpop.eup %5316  ;;  %5336 = vtanh.f32 %v877_v29  ;;  %v960_v35 = vadd.f32 %v959_v33, %v6209_v20  ;;  %v961_v36 = vpop.f32.mrb[13].mxu1  ;;  %4916 = vmatmul.mubr.msk.f32.vlgmr.msra.gmra.mrb[24].mxu0 %vm468_vm0, %v6242_v26 }
 0x142   : > { %v5319_v38 = vpop.eup %5318  ;;  %5338 = vtanh.f32 %v879_v32  ;;  %v962_v39 = vadd.f32 %v961_v36, %v6209_v20  ;;  %v882_v40 = vpop.f32.mrb[14].mxu0  ;;  %1310 = vmatpush1.msra.mxu1 %v5309_v19  ;;  %1292 = vmatprep.mubr.f32.mxu0 %v5870_v1 }
 0x143   : > { %v5321_v42 = vpop.eup %5320  ;;  %5340 = vtanh.f32 %v960_v35  ;;  %v883_v43 = vadd.f32 %v882_v40, %v6214_v28  ;;  %v884_v44 = vpop.f32.mrb[15].mxu0  ;;  %4919 = vmatmul.mubr.msk.f32.vlgmr.msra.gmra.mrb[24].mxu1 %vm468_vm0, %v6242_v26 }
 0x144   : > { %v5323_v45 = vpop.eup %5322  ;;  %5342 = vtanh.f32 %v962_v39  ;;  %v885_v46 = vadd.f32 %v884_v44, %v6214_v28  ;;  %v965_v47 = vpop.f32.mrb[14].mxu1  ;;  %1375 = vmatprep.mubr.f32.mxu1 %v5870_v1  ;;  %v5087_v48 = vpack.c.bf16 %v5321_v42, %v5313_v27 }
 0x145   : > { %v5325_v49 = vpop.eup %5324  ;;  %5344 = vtanh.f32 %v883_v43  ;;  %v966_v50 = vadd.f32 %v965_v47, %v6214_v28  ;;  %v967_v51 = vpop.f32.mrb[15].mxu1  ;;  %4917 = vmatmul.mubr.msk.f32.gmra.mrb[26].mxu0 %vm468_vm0, %v6256_v41  ;;  %v5085_v52 = vpack.c.bf16 %v5323_v45, %v5315_v31 }
 0x146   : > { %v5327_v53 = vpop.eup %5326  ;;  %5346 = vtanh.f32 %v885_v46  ;;  %v968_v54 = vadd.f32 %v967_v51, %v6214_v28  ;;  %v888_v55 = vpop.f32.mrb[16].mxu0  ;;  %1298 = vmatprep.mubr.f32.mxu0 %v5870_v1  ;;  %v5091_v57 = vpack.c.bf16 %v5325_v49, %v6246_v34 }
 0x147   : > { %v5329_v58 = vpop.eup %5328  ;;  %5348 = vtanh.f32 %v966_v50  ;;  %v889_v59 = vadd.f32 %v888_v55, %v6220_v37  ;;  %v890_v60 = vpop.f32.mrb[17].mxu0  ;;  %4920 = vmatmul.mubr.msk.f32.gmra.mrb[26].mxu1 %vm468_vm0, %v6256_v41  ;;  %5086 = vmatprep.subr.bf16.mxu0 %v5085_v52  ;;  %v5089_v61 = vpack.c.bf16 %v5327_v53, %v5319_v38 }
 0x148   : > { %v5331_v62 = vpop.eup %5330  ;;  %5350 = vtanh.f32 %v968_v54  ;;  %v891_v63 = vadd.f32 %v890_v60, %v6220_v37  ;;  %v971_v0 = vpop.f32.mrb[16].mxu1  ;;  %5088 = vmatpush1.bf16.msra.mxu0 %v5087_v48  ;;  %1381 = vmatprep.mubr.f32.mxu1 %v5870_v1 }
 0x149   : > { %v5333_v2 = vpop.eup %5332  ;;  %5352 = vtanh.f32 %v889_v59  ;;  %v972_v3 = vadd.f32 %v971_v0, %v6220_v37  ;;  %v973_v4 = vpop.f32.mrb[17].mxu1  ;;  %4918 = vmatmul.mubr.msk.f32.gmra.mrb[28].mxu0 %vm468_vm0, %v6271_v56  ;;  %1392 = vmatprep.subr.mxu0 %v5331_v62  ;;  %v6330_v0 = vld [vmem:[#allocation2 + $0x88] sm:$0xff] }
 0x14a   : > { %v5335_v5 = vpop.eup %5334  ;;  %5354 = vtanh.f32 %v891_v63  ;;  %v974_v6 = vadd.f32 %v973_v4, %v6220_v37  ;;  %5090 = vmatprep.subr.bf16.mxu1 %v5089_v61  ;;  %v1042_v7 = vpop.f32.mrb[18].mxu0  ;;  %1452 = vmatprep.mubr.f32.mxu0 %v5870_v1 }
 0x14b   : > { %v5337_v8 = vpop.eup %5336  ;;  %5356 = vtanh.f32 %v972_v3  ;;  %v1043_v9 = vadd.f32 %v1042_v7, %v6209_v20  ;;  %5092 = vmatpush1.bf16.msra.mxu1 %v5091_v57  ;;  %v1044_v10 = vpop.f32.mrb[19].mxu0 }
 0x14c   : > { %v5339_v11 = vpop.eup %5338  ;;  %5358 = vtanh.f32 %v974_v6  ;;  %v1045_v12 = vadd.f32 %v1044_v10, %v6209_v20  ;;  %4921 = vmatmul.mubr.msk.f32.gmra.mrb[28].mxu1 %vm468_vm0, %v6271_v56  ;;  %1475 = vmatprep.subr.mxu1 %v5335_v5  ;;  %v1125_v13 = vpop.f32.mrb[18].mxu1 }
 0x14d   : > { %v5341_v14 = vpop.eup %5340  ;;  %5360 = vtanh.f32 %v1043_v9  ;;  %v1126_v15 = vadd.f32 %v1125_v13, %v6209_v20  ;;  %1393 = vmatpush1.msra.mxu0 %v5329_v58  ;;  %v1127_v16 = vpop.f32.mrb[19].mxu1  ;;  %1535 = vmatprep.mubr.f32.mxu1 %v5870_v1 }
 0x14e   : > { %v5343_v17 = vpop.eup %5342  ;;  %5362 = vtanh.f32 %v1045_v12  ;;  %v1128_v18 = vadd.f32 %v1127_v16, %v6209_v20  ;;  %4922 = vmatmul.mubr.msk.f32.vlgmr.msra.gmra.mrb[30].mxu0 %vm468_vm0, %v6242_v26  ;;  %v1048_v19 = vpop.f32.mrb[20].mxu0 }
 0x14f   : > { %v5345_v21 = vpop.eup %5344  ;;  %5364 = vtanh.f32 %v1126_v15  ;;  %v1049_v22 = vadd.f32 %v1048_v19, %v6214_v28  ;;  %1476 = vmatpush1.msra.mxu1 %v5333_v2  ;;  %v1050_v23 = vpop.f32.mrb[21].mxu0  ;;  %1458 = vmatprep.mubr.f32.mxu0 %v5870_v1 }
 0x150   : > { %v5347_v24 = vpop.eup %5346  ;;  %5366 = vtanh.f32 %v1128_v18  ;;  %v1051_v25 = vadd.f32 %v1050_v23, %v6214_v28  ;;  %4925 = vmatmul.mubr.msk.f32.vlgmr.msra.gmra.mrb[30].mxu1 %vm468_vm0, %v6242_v26  ;;  %v1131_v20 = vpop.f32.mrb[20].mxu1  ;;  %v5095_v27 = vpack.c.bf16 %v5345_v21, %v5337_v8 }
 0x151   : > { %v5349_v29 = vpop.eup %5348  ;;  %5368 = vtanh.f32 %v1049_v22  ;;  %v1132_v30 = vadd.f32 %v1131_v20, %v6214_v28  ;;  %v1133_v31 = vpop.f32.mrb[21].mxu1  ;;  %1541 = vmatprep.mubr.f32.mxu1 %v5870_v1  ;;  %v5093_v32 = vpack.c.bf16 %v5347_v24, %v5339_v11 }
 0x152   : > { %v5351_v33 = vpop.eup %5350  ;;  %5370 = vtanh.f32 %v1051_v25  ;;  %v1134_v34 = vadd.f32 %v1133_v31, %v6214_v28  ;;  %4923 = vmatmul.mubr.msk.f32.gmra.mrb[32].mxu0 %vm468_vm0, %v6256_v41  ;;  %v1054_v35 = vpop.f32.mrb[22].mxu0  ;;  %v5099_v36 = vpack.c.bf16 %v5349_v29, %v5341_v14 }
 0x153   : > { %v5353_v38 = vpop.eup %5352  ;;  %5372 = vtanh.f32 %v1132_v30  ;;  %v1056_v39 = vpop.f32.mrb[23].mxu0  ;;  %5094 = vmatprep.subr.bf16.mxu0 %v5093_v32  ;;  %1464 = vmatprep.mubr.f32.mxu0 %v5870_v1  ;;  %v5097_v40 = vpack.c.bf16 %v5351_v33, %v5343_v17  ;;  %v1055_v47 = vadd.f32 %v1054_v35, %v6220_v37 }
 0x154   : > { %v5355_v42 = vpop.eup %5354  ;;  %5374 = vtanh.f32 %v1134_v34  ;;  %v1057_v43 = vadd.f32 %v1056_v39, %v6220_v37  ;;  %4926 = vmatmul.mubr.msk.f32.gmra.mrb[32].mxu1 %vm468_vm0, %v6256_v41  ;;  %v1137_v28 = vpop.f32.mrb[22].mxu1  ;;  %5096 = vmatpush1.bf16.msra.mxu0 %v5095_v27 }
 0x155   : > { %v5357_v44 = vpop.eup %5356  ;;  %v1139_v45 = vpop.f32.mrb[23].mxu1  ;;  %1558 = vmatprep.subr.mxu0 %v5355_v42  ;;  %5098 = vmatprep.subr.bf16.mxu1 %v5097_v40  ;;  %v1138_v51 = vadd.f32 %v1137_v28, %v6220_v37 }
 0x156   : > { %v5359_v46 = vpop.eup %5358  ;;  %5376 = vtanh.f32 %v1057_v43  ;;  %v1140_v48 = vadd.f32 %v1139_v45, %v6220_v37  ;;  %4924 = vmatmul.mubr.msk.f32.gmra.mrb[34].mxu0 %vm468_vm0, %v6271_v56  ;;  %1547 = vmatprep.mubr.f32.mxu1 %v5870_v1  ;;  %v6360_v9 = vpop.permute.xlu0 %1205 }
 0x157   : > { %v5361_v49 = vpop.eup %5360  ;;  %5100 = vmatpush1.bf16.msra.mxu1 %v5099_v36  ;;  %1618 = vmatprep.mubr.f32.mxu0 %v5870_v1 }
 0x158   : > { %v5363_v50 = vpop.eup %5362  ;;  %5378 = vtanh.f32 %v1140_v48  ;;  %4927 = vmatmul.mubr.msk.f32.gmra.mrb[34].mxu1 %vm468_vm0, %v6271_v56  ;;  %1641 = vmatprep.subr.mxu1 %v5359_v46 }
 0x159   : > { %v5365_v52 = vpop.eup %5364  ;;  %1559 = vmatpush1.msra.mxu0 %v5353_v38  ;;  %1701 = vmatprep.mubr.f32.mxu1 %v5870_v1  ;;  %5380 = vtanh.f32 %v1055_v47 }
 0x15a   : > { %v5367_v53 = vpop.eup %5366  ;;  %4928 = vmatmul.mubr.msk.f32.vlgmr.msra.gmra.mrb[36].mxu0 %vm468_vm0, %v6242_v26  ;;  %5382 = vtanh.f32 %v1138_v51 }
 0x15b   : > { %v5369_v54 = vpop.eup %5368  ;;  %1642 = vmatpush1.msra.mxu1 %v5357_v44  ;;  %1624 = vmatprep.mubr.f32.mxu0 %v5870_v1 }
 0x15c   : > { %v5371_v55 = vpop.eup %5370  ;;  %4931 = vmatmul.mubr.msk.f32.vlgmr.msra.gmra.mrb[36].mxu1 %vm468_vm0, %v6242_v26  ;;  %v5103_v37 = vpack.c.bf16 %v5369_v54, %v5361_v49 }
 0x15d   : > { %v5373_v57 = vpop.eup %5372  ;;  %1707 = vmatprep.mubr.f32.mxu1 %v5870_v1  ;;  %v5101_v58 = vpack.c.bf16 %v5371_v55, %v5363_v50 }
 0x15e   : > { %v5375_v59 = vpop.eup %5374  ;;  %4929 = vmatmul.mubr.msk.f32.gmra.mrb[38].mxu0 %vm468_vm0, %v6256_v41  ;;  %v5107_v60 = vpack.c.bf16 %v5373_v57, %v5365_v52 }
 0x15f   : > { %5102 = vmatprep.subr.bf16.mxu0 %v5101_v58  ;;  %1630 = vmatprep.mubr.f32.mxu0 %v5870_v1  ;;  %v5105_v61 = vpack.c.bf16 %v5375_v59, %v5367_v53 }
 0x160   : > { %v5377_v62 = vpop.eup %5376  ;;  %4932 = vmatmul.mubr.msk.f32.gmra.mrb[38].mxu1 %vm468_vm0, %v6256_v41  ;;  %5104 = vmatpush1.bf16.msra.mxu0 %v5103_v37 }
 0x161   : > { %1724 = vmatprep.subr.mxu0 %v5377_v62  ;;  %5106 = vmatprep.subr.bf16.mxu1 %v5105_v61 }
 0x162   : > { %v5379_v63 = vpop.eup %5378  ;;  %4930 = vmatmul.mubr.msk.f32.gmra.mrb[40].mxu0 %vm468_vm0, %v6271_v56  ;;  %1713 = vmatprep.mubr.f32.mxu1 %v6330_v0 }
 0x163   : > { %5108 = vmatpush1.bf16.msra.mxu1 %v5107_v60  ;;  %1784 = vmatprep.mubr.f32.mxu0 %v6330_v0  ;;  %v5381_v1 = vpop.eup %5380 }
 0x164   : > { %4933 = vmatmul.mubr.msk.f32.gmra.mrb[40].mxu1 %vm468_vm0, %v6271_v56  ;;  %1807 = vmatprep.subr.mxu1 %v5379_v63  ;;  %v5383_v2 = vpop.eup %5382 }
 0x165   : > { %1725 = vmatpush1.msra.mxu0 %v5381_v1  ;;  %1867 = vmatprep.mubr.f32.mxu1 %v6330_v0 }
 0x166   : > { %4934 = vmatmul.mubr.msk.f32.vlgmr.msra.gmra.mrb[42].mxu0 %vm468_vm0, %v6242_v26 }
 0x167   : > { %1808 = vmatpush1.msra.mxu1 %v5383_v2  ;;  %1790 = vmatprep.mubr.f32.mxu0 %v6330_v0 }
 0x168   : > { %4937 = vmatmul.mubr.msk.f32.vlgmr.msra.gmra.mrb[42].mxu1 %vm468_vm0, %v6242_v26  ;;  %v6355_v26 = vpop.permute.xlu1 %1200 }
 0x169   : > { %1873 = vmatprep.mubr.f32.mxu1 %v6330_v0 }
 0x16a   : > { %4935 = vmatmul.mubr.msk.f32.gmra.mrb[44].mxu0 %vm468_vm0, %v6256_v41 }
 0x16b   : > { %1796 = vmatprep.mubr.f32.mxu0 %v6330_v0 }
 0x16c   : > { %4938 = vmatmul.mubr.msk.f32.gmra.mrb[44].mxu1 %vm468_vm0, %v6256_v41  ;;  %v6366_v17 = vpop.permute.xlu1 %1210 }
 0x16d   : > { %1879 = vmatprep.mubr.f32.mxu1 %v6330_v0 }
 0x16e   : > { %4936 = vmatmul.mubr.msk.f32.gmra.mrb[46].mxu0 %vm468_vm0, %v6271_v56 }
 0x16f   : > { %2030 = vmatprep.mubr.f32.mxu0 %v6330_v0 }
 0x170   : > { %4939 = vmatmul.mubr.msk.f32.gmra.mrb[46].mxu1 %vm468_vm0, %v6271_v56 }
 0x171   : > { %2113 = vmatprep.mubr.f32.mxu1 %v6330_v0 }
 0x214   : > { %v1288_v3 = vpop.f32.mrb[24].mxu0 }
 0x215   : > { %v1289_v4 = vadd.f32 %v1288_v3, %v6355_v26  ;;  %v1290_v5 = vpop.f32.mrb[25].mxu0 }
 0x216   : > { %v1291_v41 = vadd.f32 %v1290_v5, %v6355_v26  ;;  %v1371_v6 = vpop.f32.mrb[24].mxu1  ;;  %v6387_v5 = vld [vmem:[%s6927_s1 + $0x30] sm:$0xff] }
 0x217   : > { %5384 = vtanh.f32 %v1289_v4  ;;  %v1372_v7 = vadd.f32 %v1371_v6, %v6355_v26  ;;  %v1373_v8 = vpop.f32.mrb[25].mxu1 }
 0x218   : > { %5386 = vtanh.f32 %v1291_v41  ;;  %v1374_v56 = vadd.f32 %v1373_v8, %v6355_v26  ;;  %v1294_v10 = vpop.f32.mrb[26].mxu0 }
 0x219   : > { %5388 = vtanh.f32 %v1372_v7  ;;  %v1295_v11 = vadd.f32 %v1294_v10, %v6360_v9  ;;  %v1296_v12 = vpop.f32.mrb[27].mxu0 }
 0x21a   : > { %5390 = vtanh.f32 %v1374_v56  ;;  %v1297_v13 = vadd.f32 %v1296_v12, %v6360_v9  ;;  %v1377_v14 = vpop.f32.mrb[26].mxu1 }
 0x21b   : > { %5392 = vtanh.f32 %v1295_v11  ;;  %v1378_v15 = vadd.f32 %v1377_v14, %v6360_v9  ;;  %v1379_v16 = vpop.f32.mrb[27].mxu1 }
 0x21c   : > { %5394 = vtanh.f32 %v1297_v13  ;;  %v1380_v18 = vadd.f32 %v1379_v16, %v6360_v9  ;;  %v1300_v19 = vpop.f32.mrb[28].mxu0 }
 0x21d   : > { %5396 = vtanh.f32 %v1378_v15  ;;  %v1301_v21 = vadd.f32 %v1300_v19, %v6366_v17  ;;  %v1302_v22 = vpop.f32.mrb[29].mxu0 }
 0x21e   : > { %5398 = vtanh.f32 %v1380_v18  ;;  %v1303_v23 = vadd.f32 %v1302_v22, %v6366_v17  ;;  %v6401_v18 = vld [vmem:[%s6927_s1 + $0x38] sm:$0xff] }
 0x21f   : > { %v1383_v24 = vpop.f32.mrb[28].mxu1 }
 0x220   : > { %5400 = vtanh.f32 %v1303_v23  ;;  %v1384_v25 = vadd.f32 %v1383_v24, %v6366_v17  ;;  %v1385_v20 = vpop.f32.mrb[29].mxu1 }
 0x221   : > { %v5385_v27 = vpop.eup %5384  ;;  %5402 = vtanh.f32 %v1301_v21  ;;  %v1386_v29 = vadd.f32 %v1385_v20, %v6366_v17  ;;  %v1454_v30 = vpop.f32.mrb[30].mxu0 }
 0x222   : > { %v5387_v31 = vpop.eup %5386  ;;  %5404 = vtanh.f32 %v1384_v25  ;;  %v1455_v32 = vadd.f32 %v1454_v30, %v6355_v26  ;;  %v1456_v33 = vpop.f32.mrb[31].mxu0 }
 0x223   : > { %v5389_v34 = vpop.eup %5388  ;;  %5406 = vtanh.f32 %v1386_v29  ;;  %v1457_v35 = vadd.f32 %v1456_v33, %v6355_v26  ;;  %v1537_v36 = vpop.f32.mrb[30].mxu1 }
 0x224   : > { %v5391_v38 = vpop.eup %5390  ;;  %5408 = vtanh.f32 %v1455_v32  ;;  %v1538_v39 = vadd.f32 %v1537_v36, %v6355_v26  ;;  %v1539_v40 = vpop.f32.mrb[31].mxu1 }
 0x225   : > { %v5393_v42 = vpop.eup %5392  ;;  %5410 = vtanh.f32 %v1457_v35  ;;  %v1540_v43 = vadd.f32 %v1539_v40, %v6355_v26  ;;  %v1460_v28 = vpop.f32.mrb[32].mxu0 }
 0x226   : > { %v5395_v44 = vpop.eup %5394  ;;  %5412 = vtanh.f32 %v1538_v39  ;;  %v1461_v45 = vadd.f32 %v1460_v28, %v6360_v9  ;;  %v1462_v46 = vpop.f32.mrb[33].mxu0  ;;  %v5111_v47 = vpack.c.bf16 %v5393_v42, %v5385_v27  ;;  %v6419_v39 = vld [vmem:[%s6927_s1 + $0x40] sm:$0xff] }
 0x227   : > { %v5397_v48 = vpop.eup %5396  ;;  %5414 = vtanh.f32 %v1540_v43  ;;  %v1463_v49 = vadd.f32 %v1462_v46, %v6360_v9  ;;  %v1543_v50 = vpop.f32.mrb[32].mxu1  ;;  %v5109_v51 = vpack.c.bf16 %v5395_v44, %v5387_v31 }
 0x228   : > { %v5399_v52 = vpop.eup %5398  ;;  %5416 = vtanh.f32 %v1461_v45  ;;  %v1544_v53 = vadd.f32 %v1543_v50, %v6360_v9  ;;  %v1545_v54 = vpop.f32.mrb[33].mxu1  ;;  %v5115_v55 = vpack.c.bf16 %v5397_v48, %v5389_v34 }
 0x229   : > { %5418 = vtanh.f32 %v1463_v49  ;;  %v1546_v37 = vadd.f32 %v1545_v54, %v6360_v9  ;;  %v1466_v57 = vpop.f32.mrb[34].mxu0  ;;  %5110 = vmatprep.subr.bf16.mxu0 %v5109_v51  ;;  %v5113_v58 = vpack.c.bf16 %v5399_v52, %v5391_v38 }
 0x22a   : > { %v5401_v59 = vpop.eup %5400  ;;  %5420 = vtanh.f32 %v1544_v53  ;;  %v1467_v60 = vadd.f32 %v1466_v57, %v6366_v17  ;;  %v1468_v61 = vpop.f32.mrb[35].mxu0  ;;  %5112 = vmatpush1.bf16.msra.mxu0 %v5111_v47 }
 0x22b   : > { %v5403_v62 = vpop.eup %5402  ;;  %5422 = vtanh.f32 %v1546_v37  ;;  %v1469_v63 = vadd.f32 %v1468_v61, %v6366_v17  ;;  %v1549_v1 = vpop.f32.mrb[34].mxu1  ;;  %1970 = vmatprep.subr.mxu0 %v5401_v59  ;;  %5114 = vmatprep.subr.bf16.mxu1 %v5113_v58 }
 0x22c   : > { %v5405_v2 = vpop.eup %5404  ;;  %5424 = vtanh.f32 %v1467_v60  ;;  %v1550_v3 = vadd.f32 %v1549_v1, %v6366_v17  ;;  %v1551_v4 = vpop.f32.mrb[35].mxu1  ;;  %5116 = vmatpush1.bf16.msra.mxu1 %v5115_v55 }
 0x22d   : > { %v5407_v41 = vpop.eup %5406  ;;  %5426 = vtanh.f32 %v1469_v63  ;;  %v1552_v6 = vadd.f32 %v1551_v4, %v6366_v17  ;;  %v1620_v7 = vpop.f32.mrb[36].mxu0 }
 0x22e   : > { %v5409_v8 = vpop.eup %5408  ;;  %5428 = vtanh.f32 %v1550_v3  ;;  %v1621_v56 = vadd.f32 %v1620_v7, %v6355_v26  ;;  %v1622_v10 = vpop.f32.mrb[37].mxu0  ;;  %2053 = vmatprep.subr.mxu1 %v5407_v41  ;;  %1971 = vmatpush1.msra.mxu0 %v5403_v62 }
 0x22f   : > { %v5411_v11 = vpop.eup %5410  ;;  %5430 = vtanh.f32 %v1552_v6  ;;  %v1623_v12 = vadd.f32 %v1622_v10, %v6355_v26  ;;  %v1703_v13 = vpop.f32.mrb[36].mxu1  ;;  %4946 = vmatmul.mubr.msk.f32.vlgmr.msra.gmra.mrb[48].mxu0 %vm468_vm0, %v6387_v5 }
 0x230   : > { %v6394_v14 = vpop.eup %5412  ;;  %5432 = vtanh.f32 %v1621_v56  ;;  %v1704_v15 = vadd.f32 %v1703_v13, %v6355_v26  ;;  %v1705_v16 = vpop.f32.mrb[37].mxu1  ;;  %2054 = vmatpush1.msra.mxu1 %v5405_v2  ;;  %2036 = vmatprep.mubr.f32.mxu0 %v6330_v0 }
 0x231   : > { %v5415_v19 = vpop.eup %5414  ;;  %5434 = vtanh.f32 %v1623_v12  ;;  %v1706_v21 = vadd.f32 %v1705_v16, %v6355_v26  ;;  %v1626_v22 = vpop.f32.mrb[38].mxu0  ;;  %4949 = vmatmul.mubr.msk.f32.vlgmr.msra.gmra.mrb[48].mxu1 %vm468_vm0, %v6387_v5 }
 0x232   : > { %v5417_v23 = vpop.eup %5416  ;;  %5436 = vtanh.f32 %v1704_v15  ;;  %v1627_v24 = vadd.f32 %v1626_v22, %v6360_v9  ;;  %v1628_v25 = vpop.f32.mrb[39].mxu0  ;;  %2119 = vmatprep.mubr.f32.mxu1 %v6330_v0 }
 0x233   : > { %v5419_v20 = vpop.eup %5418  ;;  %5438 = vtanh.f32 %v1706_v21  ;;  %v1629_v27 = vadd.f32 %v1628_v25, %v6360_v9  ;;  %v1709_v29 = vpop.f32.mrb[38].mxu1  ;;  %4947 = vmatmul.mubr.msk.f32.gmra.mrb[50].mxu0 %vm468_vm0, %v6401_v18  ;;  %v5119_v30 = vpack.c.bf16 %v5417_v23, %v5409_v8 }
 0x234   : > { %v5421_v31 = vpop.eup %5420  ;;  %5440 = vtanh.f32 %v1627_v24  ;;  %v1710_v32 = vadd.f32 %v1709_v29, %v6360_v9  ;;  %v1711_v33 = vpop.f32.mrb[39].mxu1  ;;  %v5117_v34 = vpack.c.bf16 %v5419_v20, %v5411_v11  ;;  %2042 = vmatprep.mubr.f32.mxu0 %v6330_v0 }
 0x235   : > { %v5423_v35 = vpop.eup %5422  ;;  %5442 = vtanh.f32 %v1629_v27  ;;  %v1712_v36 = vadd.f32 %v1711_v33, %v6360_v9  ;;  %v1632_v38 = vpop.f32.mrb[40].mxu0  ;;  %4950 = vmatmul.mubr.msk.f32.gmra.mrb[50].mxu1 %vm468_vm0, %v6401_v18  ;;  %v5123_v40 = vpack.c.bf16 %v5421_v31, %v6394_v14 }
 0x236   : > { %v5425_v42 = vpop.eup %5424  ;;  %5444 = vtanh.f32 %v1710_v32  ;;  %v1633_v43 = vadd.f32 %v1632_v38, %v6366_v17  ;;  %v1634_v28 = vpop.f32.mrb[41].mxu0  ;;  %5118 = vmatprep.subr.bf16.mxu0 %v5117_v34  ;;  %v5121_v44 = vpack.c.bf16 %v5423_v35, %v5415_v19  ;;  %2125 = vmatprep.mubr.f32.mxu1 %v6330_v0 }
 0x237   : > { %v5427_v45 = vpop.eup %5426  ;;  %5446 = vtanh.f32 %v1712_v36  ;;  %v1635_v46 = vadd.f32 %v1634_v28, %v6366_v17  ;;  %v1715_v47 = vpop.f32.mrb[40].mxu1  ;;  %5120 = vmatpush1.bf16.msra.mxu0 %v5119_v30 }
 0x238   : > { %v5429_v48 = vpop.eup %5428  ;;  %5448 = vtanh.f32 %v1633_v43  ;;  %v1716_v49 = vadd.f32 %v1715_v47, %v6366_v17  ;;  %v1717_v50 = vpop.f32.mrb[41].mxu1  ;;  %4948 = vmatmul.mubr.msk.f32.gmra.mrb[52].mxu0 %vm468_vm0, %v6419_v39  ;;  %2136 = vmatprep.subr.mxu0 %v5427_v45 }
 0x239   : > { %v5431_v51 = vpop.eup %5430  ;;  %5450 = vtanh.f32 %v1635_v46  ;;  %v1718_v52 = vadd.f32 %v1717_v50, %v6366_v17  ;;  %5122 = vmatprep.subr.bf16.mxu1 %v5121_v44  ;;  %v1786_v53 = vpop.f32.mrb[42].mxu0  ;;  %4951 = vmatmul.mubr.msk.f32.gmra.mrb[52].mxu1 %vm468_vm0, %v6419_v39 }
 0x23a   : > { %v5433_v54 = vpop.eup %5432  ;;  %5452 = vtanh.f32 %v1716_v49  ;;  %v1787_v55 = vadd.f32 %v1786_v53, %v6355_v26  ;;  %5124 = vmatpush1.bf16.msra.mxu1 %v5123_v40  ;;  %v1788_v37 = vpop.f32.mrb[43].mxu0  ;;  %2196 = vmatprep.mubr.f32.mxu0 %v6330_v0 }
 0x23b   : > { %v5435_v57 = vpop.eup %5434  ;;  %5454 = vtanh.f32 %v1718_v52  ;;  %v1789_v58 = vadd.f32 %v1788_v37, %v6355_v26  ;;  %2219 = vmatprep.subr.mxu1 %v5431_v51  ;;  %v1869_v59 = vpop.f32.mrb[42].mxu1  ;;  %2137 = vmatpush1.msra.mxu0 %v5425_v42 }
 0x23c   : > { %v5437_v60 = vpop.eup %5436  ;;  %5456 = vtanh.f32 %v1787_v55  ;;  %v1870_v61 = vadd.f32 %v1869_v59, %v6355_v26  ;;  %v1871_v62 = vpop.f32.mrb[43].mxu1  ;;  %4952 = vmatmul.mubr.msk.f32.vlgmr.msra.gmra.mrb[54].mxu0 %vm468_vm0, %v6387_v5  ;;  %2279 = vmatprep.mubr.f32.mxu1 %v6330_v0 }
 0x23d   : > { %v5439_v63 = vpop.eup %5438  ;;  %5458 = vtanh.f32 %v1789_v58  ;;  %v1872_v1 = vadd.f32 %v1871_v62, %v6355_v26  ;;  %v1792_v2 = vpop.f32.mrb[44].mxu0  ;;  %2202 = vmatprep.mubr.f32.mxu0 %v6330_v0 }
 0x23e   : > { %v5441_v3 = vpop.eup %5440  ;;  %5460 = vtanh.f32 %v1870_v61  ;;  %v1793_v4 = vadd.f32 %v1792_v2, %v6360_v9  ;;  %2220 = vmatpush1.msra.mxu1 %v5429_v48  ;;  %v1794_v41 = vpop.f32.mrb[45].mxu0 }
 0x23f   : > { %v5443_v6 = vpop.eup %5442  ;;  %5462 = vtanh.f32 %v1872_v1  ;;  %v1795_v7 = vadd.f32 %v1794_v41, %v6360_v9  ;;  %4955 = vmatmul.mubr.msk.f32.vlgmr.msra.gmra.mrb[54].mxu1 %vm468_vm0, %v6387_v5  ;;  %v1875_v8 = vpop.f32.mrb[44].mxu1  ;;  %v5127_v56 = vpack.c.bf16 %v5441_v3, %v5433_v54 }
 0x240   : > { %v5445_v10 = vpop.eup %5444  ;;  %5464 = vtanh.f32 %v1793_v4  ;;  %v1876_v26 = vadd.f32 %v1875_v8, %v6360_v9  ;;  %v1877_v11 = vpop.f32.mrb[45].mxu1  ;;  %4953 = vmatmul.mubr.msk.f32.gmra.mrb[56].mxu0 %vm468_vm0, %v6401_v18  ;;  %2285 = vmatprep.mubr.f32.mxu1 %v6330_v0  ;;  %v5125_v12 = vpack.c.bf16 %v5443_v6, %v5435_v57 }
 0x241   : > { %v5447_v13 = vpop.eup %5446  ;;  %5466 = vtanh.f32 %v1795_v7  ;;  %v1878_v14 = vadd.f32 %v1877_v11, %v6360_v9  ;;  %v1798_v15 = vpop.f32.mrb[46].mxu0  ;;  %2208 = vmatprep.mubr.f32.mxu0 %v6330_v0  ;;  %v5131_v16 = vpack.c.bf16 %v5445_v10, %v5437_v60 }
 0x242   : > { %v5449_v19 = vpop.eup %5448  ;;  %5468 = vtanh.f32 %v1876_v26  ;;  %v1800_v21 = vpop.f32.mrb[47].mxu0  ;;  %5126 = vmatprep.subr.bf16.mxu0 %v5125_v12  ;;  %v5129_v22 = vpack.c.bf16 %v5447_v13, %v5439_v63  ;;  %v1799_v29 = vadd.f32 %v1798_v15, %v6366_v17 }
 0x243   : > { %v5451_v23 = vpop.eup %5450  ;;  %5470 = vtanh.f32 %v1878_v14  ;;  %v1801_v24 = vadd.f32 %v1800_v21, %v6366_v17  ;;  %4956 = vmatmul.mubr.msk.f32.gmra.mrb[56].mxu1 %vm468_vm0, %v6401_v18  ;;  %v1881_v25 = vpop.f32.mrb[46].mxu1  ;;  %5128 = vmatpush1.bf16.msra.mxu0 %v5127_v56 }
 0x244   : > { %v5453_v20 = vpop.eup %5452  ;;  %v1883_v9 = vpop.f32.mrb[47].mxu1  ;;  %4954 = vmatmul.mubr.msk.f32.gmra.mrb[58].mxu0 %vm468_vm0, %v6419_v39  ;;  %2302 = vmatprep.subr.mxu0 %v5451_v23  ;;  %v1882_v33 = vadd.f32 %v1881_v25, %v6366_v17 }
 0x245   : > { %v5455_v27 = vpop.eup %5454  ;;  %5472 = vtanh.f32 %v1801_v24  ;;  %v1884_v30 = vadd.f32 %v1883_v9, %v6366_v17  ;;  %5130 = vmatprep.subr.bf16.mxu1 %v5129_v22  ;;  %2291 = vmatprep.mubr.f32.mxu1 %v6330_v0  ;;  %v6504_v55 = vpop.permute.xlu1 %1949 }
 0x246   : > { %v5457_v31 = vpop.eup %5456  ;;  %5132 = vmatpush1.bf16.msra.mxu1 %v5131_v16  ;;  %2362 = vmatprep.mubr.f32.mxu0 %v6330_v0 }
 0x247   : > { %v5459_v32 = vpop.eup %5458  ;;  %5474 = vtanh.f32 %v1884_v30  ;;  %4957 = vmatmul.mubr.msk.f32.gmra.mrb[58].mxu1 %vm468_vm0, %v6419_v39  ;;  %2385 = vmatprep.subr.mxu1 %v5455_v27 }
 0x248   : > { %v5461_v34 = vpop.eup %5460  ;;  %2303 = vmatpush1.msra.mxu0 %v5449_v19  ;;  %2445 = vmatprep.mubr.f32.mxu1 %v6330_v0  ;;  %5476 = vtanh.f32 %v1799_v29 }
 0x249   : > { %v5463_v35 = vpop.eup %5462  ;;  %4958 = vmatmul.mubr.msk.f32.vlgmr.msra.gmra.mrb[60].mxu0 %vm468_vm0, %v6387_v5  ;;  %5478 = vtanh.f32 %v1882_v33 }
 0x24a   : > { %v5465_v36 = vpop.eup %5464  ;;  %2386 = vmatpush1.msra.mxu1 %v5453_v20  ;;  %2368 = vmatprep.mubr.f32.mxu0 %v6330_v0 }
 0x24b   : > { %v5467_v38 = vpop.eup %5466  ;;  %4961 = vmatmul.mubr.msk.f32.vlgmr.msra.gmra.mrb[60].mxu1 %vm468_vm0, %v6387_v5  ;;  %v5135_v17 = vpack.c.bf16 %v5465_v36, %v5457_v31 }
 0x24c   : > { %v5469_v40 = vpop.eup %5468  ;;  %2451 = vmatprep.mubr.f32.mxu1 %v6330_v0  ;;  %v5133_v42 = vpack.c.bf16 %v5467_v38, %v5459_v32 }
 0x24d   : > { %v5471_v43 = vpop.eup %5470  ;;  %4959 = vmatmul.mubr.msk.f32.gmra.mrb[62].mxu0 %vm468_vm0, %v6401_v18  ;;  %v5139_v28 = vpack.c.bf16 %v5469_v40, %v5461_v34 }
 0x24e   : > { %5134 = vmatprep.subr.bf16.mxu0 %v5133_v42  ;;  %2374 = vmatprep.mubr.f32.mxu0 %v6330_v0  ;;  %v5137_v44 = vpack.c.bf16 %v5471_v43, %v5463_v35 }
 0x24f   : > { %v5473_v45 = vpop.eup %5472  ;;  %4962 = vmatmul.mubr.msk.f32.gmra.mrb[62].mxu1 %vm468_vm0, %v6401_v18  ;;  %5136 = vmatpush1.bf16.msra.mxu0 %v5135_v17 }
 0x250   : > { %2468 = vmatprep.subr.mxu0 %v5473_v45  ;;  %5138 = vmatprep.subr.bf16.mxu1 %v5137_v44 }
 0x251   : > { %v5475_v46 = vpop.eup %5474  ;;  %4960 = vmatmul.mubr.msk.f32.gmra.mrb[64].mxu0 %vm468_vm0, %v6419_v39  ;;  %2457 = vmatprep.mubr.f32.mxu1 %v6330_v0 }
 0x252   : > { %5140 = vmatpush1.bf16.msra.mxu1 %v5139_v28  ;;  %2528 = vmatprep.mubr.f32.mxu0 %v6330_v0  ;;  %v5477_v47 = vpop.eup %5476 }
 0x253   : > { %4963 = vmatmul.mubr.msk.f32.gmra.mrb[64].mxu1 %vm468_vm0, %v6419_v39  ;;  %2551 = vmatprep.subr.mxu1 %v5475_v46  ;;  %v5479_v48 = vpop.eup %5478 }
 0x254   : > { %2469 = vmatpush1.msra.mxu0 %v5477_v47  ;;  %2611 = vmatprep.mubr.f32.mxu1 %v6330_v0 }
 0x255   : > { %4964 = vmatmul.mubr.msk.f32.vlgmr.msra.gmra.mrb[66].mxu0 %vm468_vm0, %v6387_v5 }
 0x256   : > { %2552 = vmatpush1.msra.mxu1 %v5479_v48  ;;  %2534 = vmatprep.mubr.f32.mxu0 %v6330_v0  ;;  %v6530_v48 = vld [vmem:[%s6927_s1 + $0x48] sm:$0xff] }
 0x257   : > { %4967 = vmatmul.mubr.msk.f32.vlgmr.msra.gmra.mrb[66].mxu1 %vm468_vm0, %v6387_v5  ;;  %v6499_v5 = vpop.permute.xlu0 %1944 }
 0x258   : > { %2617 = vmatprep.mubr.f32.mxu1 %v6330_v0 }
 0x259   : > { %4965 = vmatmul.mubr.msk.f32.gmra.mrb[68].mxu0 %vm468_vm0, %v6401_v18 }
 0x25a   : > { %2540 = vmatprep.mubr.f32.mxu0 %v6330_v0 }
 0x25b   : > { %4968 = vmatmul.mubr.msk.f32.gmra.mrb[68].mxu1 %vm468_vm0, %v6401_v18  ;;  %v6511_v1 = vpop.permute.xlu0 %1954 }
 0x25c   : > { %2623 = vmatprep.mubr.f32.mxu1 %v6330_v0 }
 0x25d   : > { %4966 = vmatmul.mubr.msk.f32.gmra.mrb[70].mxu0 %vm468_vm0, %v6419_v39 }
 0x25e   : > { %2774 = vmatprep.mubr.f32.mxu0 %v6330_v0 }
 0x25f   : > { %4969 = vmatmul.mubr.msk.f32.gmra.mrb[70].mxu1 %vm468_vm0, %v6419_v39 }
 0x260   : > { %2857 = vmatprep.mubr.f32.mxu1 %v6330_v0 }
 0x302   : > { %v2032_v49 = vpop.f32.mrb[48].mxu0 }
 0x303   : > { %v2033_v50 = vadd.f32 %v2032_v49, %v6499_v5  ;;  %v2034_v51 = vpop.f32.mrb[49].mxu0 }
 0x304   : > { %v2035_v18 = vadd.f32 %v2034_v51, %v6499_v5  ;;  %v2115_v52 = vpop.f32.mrb[48].mxu1 }
 0x305   : > { %5480 = vtanh.f32 %v2033_v50  ;;  %v2116_v53 = vadd.f32 %v2115_v52, %v6499_v5  ;;  %v2117_v54 = vpop.f32.mrb[49].mxu1 }
 0x306   : > { %5482 = vtanh.f32 %v2035_v18  ;;  %v2118_v39 = vadd.f32 %v2117_v54, %v6499_v5  ;;  %v2038_v37 = vpop.f32.mrb[50].mxu0 }
 0x307   : > { %5484 = vtanh.f32 %v2116_v53  ;;  %v2039_v57 = vadd.f32 %v2038_v37, %v6504_v55  ;;  %v2040_v58 = vpop.f32.mrb[51].mxu0 }
 0x308   : > { %5486 = vtanh.f32 %v2118_v39  ;;  %v2041_v59 = vadd.f32 %v2040_v58, %v6504_v55  ;;  %v2121_v60 = vpop.f32.mrb[50].mxu1 }
 0x309   : > { %5488 = vtanh.f32 %v2039_v57  ;;  %v2122_v61 = vadd.f32 %v2121_v60, %v6504_v55  ;;  %v2123_v62 = vpop.f32.mrb[51].mxu1  ;;  %v6542_v60 = vld [vmem:[%s6927_s1 + $0x50] sm:$0xff] }
 0x30a   : > { %5490 = vtanh.f32 %v2041_v59  ;;  %v2124_v63 = vadd.f32 %v2123_v62, %v6504_v55 }
 0x30b   : > { %5492 = vtanh.f32 %v2122_v61  ;;  %v2044_v2 = vpop.f32.mrb[52].mxu0 }
 0x30c   : > { %5494 = vtanh.f32 %v2124_v63  ;;  %v2045_v3 = vadd.f32 %v2044_v2, %v6511_v1  ;;  %v2046_v4 = vpop.f32.mrb[53].mxu0  ;;  %v2127_v41 = vpop.f32.mrb[52].mxu1 }
 0x30d   : > { %v2047_v6 = vadd.f32 %v2046_v4, %v6511_v1  ;;  %v2129_v7 = vpop.f32.mrb[53].mxu1  ;;  %v2128_v8 = vadd.f32 %v2127_v41, %v6511_v1 }
 0x30e   : > { %v2130_v56 = vadd.f32 %v2129_v7, %v6511_v1 }
 0x30f   : > { %v5481_v10 = vpop.eup %5480  ;;  %5496 = vtanh.f32 %v2047_v6  ;;  %v2198_v26 = vpop.f32.mrb[54].mxu0 }
 0x310   : > { %v5483_v11 = vpop.eup %5482  ;;  %5498 = vtanh.f32 %v2045_v3  ;;  %v2199_v12 = vadd.f32 %v2198_v26, %v6499_v5  ;;  %v2200_v13 = vpop.f32.mrb[55].mxu0 }
 0x311   : > { %v5485_v14 = vpop.eup %5484  ;;  %5500 = vtanh.f32 %v2130_v56  ;;  %v2201_v15 = vadd.f32 %v2200_v13, %v6499_v5 }
 0x312   : > { %v5487_v16 = vpop.eup %5486  ;;  %5502 = vtanh.f32 %v2128_v8  ;;  %v2281_v19 = vpop.f32.mrb[54].mxu1 }
 0x313   : > { %v5489_v21 = vpop.eup %5488  ;;  %5504 = vtanh.f32 %v2199_v12  ;;  %v2282_v22 = vadd.f32 %v2281_v19, %v6499_v5  ;;  %v2283_v23 = vpop.f32.mrb[55].mxu1 }
 0x314   : > { %v2204_v24 = vpop.f32.mrb[56].mxu0  ;;  %v5491_v25 = vpop.eup %5490  ;;  %5506 = vtanh.f32 %v2201_v15  ;;  %v2284_v20 = vadd.f32 %v2283_v23, %v6499_v5  ;;  %v5143_v29 = vpack.c.bf16 %v5489_v21, %v5481_v10 }
 0x315   : > { %v2205_v9 = vadd.f32 %v2204_v24, %v6504_v55  ;;  %v2206_v27 = vpop.f32.mrb[57].mxu0  ;;  %v5493_v30 = vpop.eup %5492  ;;  %5508 = vtanh.f32 %v2282_v22  ;;  %v5141_v32 = vpack.c.bf16 %v5491_v25, %v5483_v11  ;;  %v6557_v11 = vld [vmem:[%s6927_s1 + $0x58] sm:$0xff] }
 0x316   : > { %v2207_v31 = vadd.f32 %v2206_v27, %v6504_v55  ;;  %v5495_v33 = vpop.eup %5494  ;;  %5510 = vtanh.f32 %v2284_v20  ;;  %v2287_v34 = vpop.f32.mrb[56].mxu1  ;;  %v5147_v35 = vpack.c.bf16 %v5493_v30, %v5485_v14 }
 0x317   : > { %5512 = vtanh.f32 %v2205_v9  ;;  %v2288_v36 = vadd.f32 %v2287_v34, %v6504_v55  ;;  %v2289_v38 = vpop.f32.mrb[57].mxu1  ;;  %v2210_v17 = vpop.f32.mrb[58].mxu0  ;;  %5142 = vmatprep.subr.bf16.mxu0 %v5141_v32  ;;  %v5145_v40 = vpack.c.bf16 %v5495_v33, %v5487_v16 }
 0x318   : > { %5514 = vtanh.f32 %v2207_v31  ;;  %v2290_v42 = vadd.f32 %v2289_v38, %v6504_v55  ;;  %v2211_v43 = vadd.f32 %v2210_v17, %v6511_v1  ;;  %v2212_v28 = vpop.f32.mrb[59].mxu0  ;;  %5144 = vmatpush1.bf16.msra.mxu0 %v5143_v29 }
 0x319   : > { %v5497_v44 = vpop.eup %5496  ;;  %5516 = vtanh.f32 %v2288_v36  ;;  %v2213_v45 = vadd.f32 %v2212_v28, %v6511_v1  ;;  %5146 = vmatprep.subr.bf16.mxu1 %v5145_v40 }
 0x31a   : > { %v5499_v46 = vpop.eup %5498  ;;  %5518 = vtanh.f32 %v2290_v42  ;;  %v2293_v47 = vpop.f32.mrb[58].mxu1  ;;  %2714 = vmatprep.subr.mxu0 %v5497_v44  ;;  %5148 = vmatpush1.bf16.msra.mxu1 %v5147_v35 }
 0x31b   : > { %v5501_v49 = vpop.eup %5500  ;;  %5520 = vtanh.f32 %v2211_v43  ;;  %v2294_v50 = vadd.f32 %v2293_v47, %v6511_v1  ;;  %v2295_v51 = vpop.f32.mrb[59].mxu1 }
 0x31c   : > { %v5503_v18 = vpop.eup %5502  ;;  %5522 = vtanh.f32 %v2213_v45  ;;  %v2296_v52 = vadd.f32 %v2295_v51, %v6511_v1  ;;  %v2364_v53 = vpop.f32.mrb[60].mxu0  ;;  %2797 = vmatprep.subr.mxu1 %v5501_v49  ;;  %2715 = vmatpush1.msra.mxu0 %v5499_v46 }
 0x31d   : > { %v5505_v54 = vpop.eup %5504  ;;  %5524 = vtanh.f32 %v2294_v50  ;;  %v2365_v39 = vadd.f32 %v2364_v53, %v6499_v5  ;;  %v2366_v37 = vpop.f32.mrb[61].mxu0  ;;  %4976 = vmatmul.mubr.msk.f32.vlgmr.msra.gmra.mrb[72].mxu0 %vm468_vm0, %v6530_v48 }
 0x31e   : > { %v5507_v57 = vpop.eup %5506  ;;  %5526 = vtanh.f32 %v2296_v52  ;;  %v2367_v58 = vadd.f32 %v2366_v37, %v6499_v5  ;;  %v2447_v59 = vpop.f32.mrb[60].mxu1  ;;  %2798 = vmatpush1.msra.mxu1 %v5503_v18  ;;  %2780 = vmatprep.mubr.f32.mxu0 %v6330_v0 }
 0x31f   : > { %v5509_v61 = vpop.eup %5508  ;;  %5528 = vtanh.f32 %v2365_v39  ;;  %v2448_v62 = vadd.f32 %v2447_v59, %v6499_v5  ;;  %v2449_v63 = vpop.f32.mrb[61].mxu1  ;;  %4979 = vmatmul.mubr.msk.f32.vlgmr.msra.gmra.mrb[72].mxu1 %vm468_vm0, %v6530_v48  ;;  %v6585_v39 = vld [vmem:[#allocation2 + $0x88] sm:$0xff] }
 0x320   : > { %v5511_v2 = vpop.eup %5510  ;;  %5530 = vtanh.f32 %v2367_v58  ;;  %v2450_v3 = vadd.f32 %v2449_v63, %v6499_v5  ;;  %v2370_v4 = vpop.f32.mrb[62].mxu0  ;;  %2863 = vmatprep.mubr.f32.mxu1 %v6330_v0 }
 0x321   : > { %v5513_v41 = vpop.eup %5512  ;;  %5532 = vtanh.f32 %v2448_v62  ;;  %v2371_v6 = vadd.f32 %v2370_v4, %v6504_v55  ;;  %v2372_v7 = vpop.f32.mrb[63].mxu0  ;;  %4977 = vmatmul.mubr.msk.f32.gmra.mrb[74].mxu0 %vm468_vm0, %v6542_v60 }
 0x322   : > { %v5515_v8 = vpop.eup %5514  ;;  %5534 = vtanh.f32 %v2450_v3  ;;  %v2373_v56 = vadd.f32 %v2372_v7, %v6504_v55  ;;  %v2453_v10 = vpop.f32.mrb[62].mxu1  ;;  %2786 = vmatprep.mubr.f32.mxu0 %v6330_v0  ;;  %v5151_v26 = vpack.c.bf16 %v5513_v41, %v5505_v54 }
 0x323   : > { %v5517_v12 = vpop.eup %5516  ;;  %5536 = vtanh.f32 %v2371_v6  ;;  %v2454_v13 = vadd.f32 %v2453_v10, %v6504_v55  ;;  %v2455_v14 = vpop.f32.mrb[63].mxu1  ;;  %4980 = vmatmul.mubr.msk.f32.gmra.mrb[74].mxu1 %vm468_vm0, %v6542_v60  ;;  %v5149_v15 = vpack.c.bf16 %v5515_v8, %v5507_v57 }
 0x324   : > { %v5519_v16 = vpop.eup %5518  ;;  %5538 = vtanh.f32 %v2373_v56  ;;  %v2456_v19 = vadd.f32 %v2455_v14, %v6504_v55  ;;  %v2376_v21 = vpop.f32.mrb[64].mxu0  ;;  %2869 = vmatprep.mubr.f32.mxu1 %v6330_v0  ;;  %v5155_v22 = vpack.c.bf16 %v5517_v12, %v5509_v61 }
 0x325   : > { %v5521_v23 = vpop.eup %5520  ;;  %5540 = vtanh.f32 %v2454_v13  ;;  %v2377_v24 = vadd.f32 %v2376_v21, %v6511_v1  ;;  %v2378_v25 = vpop.f32.mrb[65].mxu0  ;;  %5150 = vmatprep.subr.bf16.mxu0 %v5149_v15  ;;  %4978 = vmatmul.mubr.msk.f32.gmra.mrb[76].mxu0 %vm468_vm0, %v6557_v11  ;;  %v5153_v20 = vpack.c.bf16 %v5519_v16, %v5511_v2 }
 0x326   : > { %v5523_v9 = vpop.eup %5522  ;;  %5542 = vtanh.f32 %v2456_v19  ;;  %v2379_v27 = vadd.f32 %v2378_v25, %v6511_v1  ;;  %v2459_v29 = vpop.f32.mrb[64].mxu1  ;;  %5152 = vmatpush1.bf16.msra.mxu0 %v5151_v26  ;;  %2940 = vmatprep.mubr.f32.mxu0 %v6330_v0 }
 0x327   : > { %v5525_v30 = vpop.eup %5524  ;;  %5544 = vtanh.f32 %v2377_v24  ;;  %v2460_v31 = vadd.f32 %v2459_v29, %v6511_v1  ;;  %v2461_v32 = vpop.f32.mrb[65].mxu1  ;;  %2880 = vmatprep.subr.mxu0 %v5523_v9  ;;  %5154 = vmatprep.subr.bf16.mxu1 %v5153_v20 }
 0x328   : > { %v5527_v33 = vpop.eup %5526  ;;  %5546 = vtanh.f32 %v2379_v27  ;;  %v2462_v34 = vadd.f32 %v2461_v32, %v6511_v1  ;;  %v2530_v35 = vpop.f32.mrb[66].mxu0  ;;  %5156 = vmatpush1.bf16.msra.mxu1 %v5155_v22 }
 0x329   : > { %v5529_v36 = vpop.eup %5528  ;;  %5548 = vtanh.f32 %v2460_v31  ;;  %v2531_v38 = vadd.f32 %v2530_v35, %v6499_v5  ;;  %v2532_v17 = vpop.f32.mrb[67].mxu0  ;;  %4981 = vmatmul.mubr.msk.f32.gmra.mrb[76].mxu1 %vm468_vm0, %v6557_v11  ;;  %2963 = vmatprep.subr.mxu1 %v5527_v33 }
 0x32a   : > { %v5531_v40 = vpop.eup %5530  ;;  %5550 = vtanh.f32 %v2462_v34  ;;  %v2533_v42 = vadd.f32 %v2532_v17, %v6499_v5  ;;  %v2613_v43 = vpop.f32.mrb[66].mxu1  ;;  %2881 = vmatpush1.msra.mxu0 %v5521_v23  ;;  %3023 = vmatprep.mubr.f32.mxu1 %v6330_v0 }
 0x32b   : > { %v5533_v28 = vpop.eup %5532  ;;  %5552 = vtanh.f32 %v2531_v38  ;;  %v2614_v44 = vadd.f32 %v2613_v43, %v6499_v5  ;;  %v2615_v45 = vpop.f32.mrb[67].mxu1  ;;  %4982 = vmatmul.mubr.msk.f32.vlgmr.msra.gmra.mrb[78].mxu0 %vm468_vm0, %v6530_v48 }
 0x32c   : > { %v5535_v46 = vpop.eup %5534  ;;  %5554 = vtanh.f32 %v2533_v42  ;;  %v2616_v47 = vadd.f32 %v2615_v45, %v6499_v5  ;;  %v2536_v49 = vpop.f32.mrb[68].mxu0  ;;  %2964 = vmatpush1.msra.mxu1 %v5525_v30  ;;  %2946 = vmatprep.mubr.f32.mxu0 %v6330_v0 }
 0x32d   : > { %v5537_v50 = vpop.eup %5536  ;;  %5556 = vtanh.f32 %v2614_v44  ;;  %v2537_v51 = vadd.f32 %v2536_v49, %v6504_v55  ;;  %v2538_v18 = vpop.f32.mrb[69].mxu0  ;;  %4985 = vmatmul.mubr.msk.f32.vlgmr.msra.gmra.mrb[78].mxu1 %vm468_vm0, %v6530_v48 }
 0x32e   : > { %v5539_v52 = vpop.eup %5538  ;;  %5558 = vtanh.f32 %v2616_v47  ;;  %v2539_v53 = vadd.f32 %v2538_v18, %v6504_v55  ;;  %v2619_v54 = vpop.f32.mrb[68].mxu1  ;;  %3029 = vmatprep.mubr.f32.mxu1 %v6585_v39  ;;  %v5159_v5 = vpack.c.bf16 %v5537_v50, %v5529_v36 }
 0x32f   : > { %v5541_v37 = vpop.eup %5540  ;;  %5560 = vtanh.f32 %v2537_v51  ;;  %v2620_v0 = vadd.f32 %v2619_v54, %v6504_v55  ;;  %v2621_v57 = vpop.f32.mrb[69].mxu1  ;;  %4983 = vmatmul.mubr.msk.f32.gmra.mrb[80].mxu0 %vm468_vm0, %v6542_v60  ;;  %v5157_v58 = vpack.c.bf16 %v5539_v52, %v5531_v40 }
 0x330   : > { %v5543_v59 = vpop.eup %5542  ;;  %5562 = vtanh.f32 %v2539_v53  ;;  %v2622_v61 = vadd.f32 %v2621_v57, %v6504_v55  ;;  %v2542_v62 = vpop.f32.mrb[70].mxu0  ;;  %2952 = vmatprep.mubr.f32.mxu0 %v6585_v39  ;;  %v5163_v63 = vpack.c.bf16 %v5541_v37, %v5533_v28 }
 0x331   : > { %v5545_v2 = vpop.eup %5544  ;;  %5564 = vtanh.f32 %v2620_v0  ;;  %v2544_v3 = vpop.f32.mrb[71].mxu0  ;;  %4986 = vmatmul.mubr.msk.f32.gmra.mrb[80].mxu1 %vm468_vm0, %v6542_v60  ;;  %5158 = vmatprep.subr.bf16.mxu0 %v5157_v58  ;;  %v5161_v4 = vpack.c.bf16 %v5543_v59, %v5535_v46  ;;  %v2543_v10 = vadd.f32 %v2542_v62, %v6511_v1 }
 0x332   : > { %v5547_v41 = vpop.eup %5546  ;;  %5566 = vtanh.f32 %v2622_v61  ;;  %v2545_v6 = vadd.f32 %v2544_v3, %v6511_v1  ;;  %v2625_v7 = vpop.f32.mrb[70].mxu1  ;;  %5160 = vmatpush1.bf16.msra.mxu0 %v5159_v5  ;;  %3035 = vmatprep.mubr.f32.mxu1 %v6585_v39 }
 0x333   : > { %v5549_v55 = vpop.eup %5548  ;;  %v2627_v8 = vpop.f32.mrb[71].mxu1  ;;  %4984 = vmatmul.mubr.msk.f32.gmra.mrb[82].mxu0 %vm468_vm0, %v6557_v11  ;;  %3046 = vmatprep.subr.mxu0 %v5547_v41  ;;  %v2626_v14 = vadd.f32 %v2625_v7, %v6511_v1 }
 0x334   : > { %v5551_v56 = vpop.eup %5550  ;;  %5568 = vtanh.f32 %v2545_v6  ;;  %v2628_v26 = vadd.f32 %v2627_v8, %v6511_v1  ;;  %5162 = vmatprep.subr.bf16.mxu1 %v5161_v4  ;;  %3106 = vmatprep.mubr.f32.mxu0 %v6585_v39  ;;  %v6647_v38 = vpop.permute.xlu0 %2693 }
 0x335   : > { %v5553_v12 = vpop.eup %5552  ;;  %5164 = vmatpush1.bf16.msra.mxu1 %v5163_v63 }
 0x336   : > { %v5555_v13 = vpop.eup %5554  ;;  %5570 = vtanh.f32 %v2628_v26  ;;  %4987 = vmatmul.mubr.msk.f32.gmra.mrb[82].mxu1 %vm468_vm0, %v6557_v11  ;;  %3129 = vmatprep.subr.mxu1 %v5551_v56 }
 0x337   : > { %v5557_v15 = vpop.eup %5556  ;;  %3047 = vmatpush1.msra.mxu0 %v5545_v2  ;;  %3189 = vmatprep.mubr.f32.mxu1 %v6585_v39  ;;  %5572 = vtanh.f32 %v2543_v10 }
 0x338   : > { %v5559_v16 = vpop.eup %5558  ;;  %4988 = vmatmul.mubr.msk.f32.vlgmr.msra.gmra.mrb[84].mxu0 %vm468_vm0, %v6530_v48  ;;  %5574 = vtanh.f32 %v2626_v14 }
 0x339   : > { %v5561_v19 = vpop.eup %5560  ;;  %3130 = vmatpush1.msra.mxu1 %v5549_v55  ;;  %3112 = vmatprep.mubr.f32.mxu0 %v6585_v39 }
 0x33a   : > { %v5563_v21 = vpop.eup %5562  ;;  %4991 = vmatmul.mubr.msk.f32.vlgmr.msra.gmra.mrb[84].mxu1 %vm468_vm0, %v6530_v48  ;;  %v5167_v1 = vpack.c.bf16 %v5561_v19, %v5553_v12 }
 0x33b   : > { %v5565_v22 = vpop.eup %5564  ;;  %3195 = vmatprep.mubr.f32.mxu1 %v6585_v39  ;;  %v5165_v23 = vpack.c.bf16 %v5563_v21, %v5555_v13 }
 0x33c   : > { %v5567_v24 = vpop.eup %5566  ;;  %4989 = vmatmul.mubr.msk.f32.gmra.mrb[86].mxu0 %vm468_vm0, %v6542_v60  ;;  %v5171_v25 = vpack.c.bf16 %v5565_v22, %v5557_v15 }
 0x33d   : > { %5166 = vmatprep.subr.bf16.mxu0 %v5165_v23  ;;  %3118 = vmatprep.mubr.f32.mxu0 %v6585_v39  ;;  %v5169_v20 = vpack.c.bf16 %v5567_v24, %v5559_v16 }
 0x33e   : > { %v5569_v9 = vpop.eup %5568  ;;  %4992 = vmatmul.mubr.msk.f32.gmra.mrb[86].mxu1 %vm468_vm0, %v6542_v60  ;;  %5168 = vmatpush1.bf16.msra.mxu0 %v5167_v1 }
 0x33f   : > { %3212 = vmatprep.subr.mxu0 %v5569_v9  ;;  %5170 = vmatprep.subr.bf16.mxu1 %v5169_v20 }
 0x340   : > { %v5571_v27 = vpop.eup %5570  ;;  %4990 = vmatmul.mubr.msk.f32.gmra.mrb[88].mxu0 %vm468_vm0, %v6557_v11  ;;  %3201 = vmatprep.mubr.f32.mxu1 %v6585_v39 }
 0x341   : > { %5172 = vmatpush1.bf16.msra.mxu1 %v5171_v25  ;;  %3272 = vmatprep.mubr.f32.mxu0 %v6585_v39  ;;  %v5573_v29 = vpop.eup %5572 }
 0x342   : > { %4993 = vmatmul.mubr.msk.f32.gmra.mrb[88].mxu1 %vm468_vm0, %v6557_v11  ;;  %3295 = vmatprep.subr.mxu1 %v5571_v27  ;;  %v5575_v30 = vpop.eup %5574 }
 0x343   : > { %3213 = vmatpush1.msra.mxu0 %v5573_v29  ;;  %3355 = vmatprep.mubr.f32.mxu1 %v6585_v39  ;;  %v6673_v29 = vld [vmem:[%s6927_s1 + $0x60] sm:$0xff] }
 0x344   : > { %4994 = vmatmul.mubr.msk.f32.vlgmr.msra.gmra.mrb[90].mxu0 %vm468_vm0, %v6530_v48 }
 0x345   : > { %3296 = vmatpush1.msra.mxu1 %v5575_v30  ;;  %3278 = vmatprep.mubr.f32.mxu0 %v6585_v39 }
 0x346   : > { %4997 = vmatmul.mubr.msk.f32.vlgmr.msra.gmra.mrb[90].mxu1 %vm468_vm0, %v6530_v48  ;;  %v6642_v48 = vpop.permute.xlu1 %2688 }
 0x347   : > { %3361 = vmatprep.mubr.f32.mxu1 %v6585_v39 }
 0x348   : > { %4995 = vmatmul.mubr.msk.f32.gmra.mrb[92].mxu0 %vm468_vm0, %v6542_v60 }
 0x349   : > { %3284 = vmatprep.mubr.f32.mxu0 %v6585_v39 }
 0x34a   : > { %4998 = vmatmul.mubr.msk.f32.gmra.mrb[92].mxu1 %vm468_vm0, %v6542_v60  ;;  %v6654_v49 = vpop.permute.xlu1 %2698 }
 0x34b   : > { %3367 = vmatprep.mubr.f32.mxu1 %v6585_v39 }
 0x34c   : > { %4996 = vmatmul.mubr.msk.f32.gmra.mrb[94].mxu0 %vm468_vm0, %v6557_v11 }
 0x34d   : > { %3518 = vmatprep.mubr.f32.mxu0 %v6585_v39 }
 0x34e   : > { %4999 = vmatmul.mubr.msk.f32.gmra.mrb[94].mxu1 %vm468_vm0, %v6557_v11 }
 0x34f   : > { %3601 = vmatprep.mubr.f32.mxu1 %v6585_v39 }
 0x3f0   : > { %v2776_v31 = vpop.f32.mrb[72].mxu0 }
 0x3f1   : > { %v2777_v32 = vadd.f32 %v2776_v31, %v6642_v48  ;;  %v2778_v33 = vpop.f32.mrb[73].mxu0 }
 0x3f2   : > { %v2779_v60 = vadd.f32 %v2778_v33, %v6642_v48  ;;  %v2859_v34 = vpop.f32.mrb[72].mxu1 }
 0x3f3   : > { %5576 = vtanh.f32 %v2777_v32  ;;  %v2860_v35 = vadd.f32 %v2859_v34, %v6642_v48  ;;  %v2861_v36 = vpop.f32.mrb[73].mxu1 }
 0x3f4   : > { %5578 = vtanh.f32 %v2779_v60  ;;  %v2862_v11 = vadd.f32 %v2861_v36, %v6642_v48  ;;  %v2782_v17 = vpop.f32.mrb[74].mxu0 }
 0x3f5   : > { %5580 = vtanh.f32 %v2860_v35  ;;  %v2783_v40 = vadd.f32 %v2782_v17, %v6647_v38  ;;  %v2784_v42 = vpop.f32.mrb[75].mxu0 }
 0x3f6   : > { %5582 = vtanh.f32 %v2862_v11  ;;  %v2785_v43 = vadd.f32 %v2784_v42, %v6647_v38  ;;  %v2865_v28 = vpop.f32.mrb[74].mxu1  ;;  %v6684_v42 = vld [vmem:[%s6927_s1 + $0x68] sm:$0xff] }
 0x3f7   : > { %5584 = vtanh.f32 %v2783_v40  ;;  %v2866_v44 = vadd.f32 %v2865_v28, %v6647_v38  ;;  %v2867_v45 = vpop.f32.mrb[75].mxu1 }
 0x3f8   : > { %5586 = vtanh.f32 %v2785_v43  ;;  %v2868_v46 = vadd.f32 %v2867_v45, %v6647_v38  ;;  %v2788_v47 = vpop.f32.mrb[76].mxu0 }
 0x3f9   : > { %5588 = vtanh.f32 %v2866_v44  ;;  %v2790_v50 = vpop.f32.mrb[77].mxu0  ;;  %v2789_v51 = vadd.f32 %v2788_v47, %v6654_v49 }
 0x3fa   : > { %5590 = vtanh.f32 %v2868_v46  ;;  %v2791_v18 = vadd.f32 %v2790_v50, %v6654_v49 }
 0x3fc   : > { %5592 = vtanh.f32 %v2791_v18  ;;  %v2871_v52 = vpop.f32.mrb[76].mxu1 }
 0x3fd   : > { %v5577_v53 = vpop.eup %5576  ;;  %v2872_v54 = vadd.f32 %v2871_v52, %v6654_v49  ;;  %v2873_v5 = vpop.f32.mrb[77].mxu1  ;;  %5594 = vtanh.f32 %v2789_v51 }
 0x3fe   : > { %v5579_v37 = vpop.eup %5578  ;;  %v2874_v0 = vadd.f32 %v2873_v5, %v6654_v49  ;;  %v2942_v57 = vpop.f32.mrb[78].mxu0 }
 0x3ff   : > { %v5581_v58 = vpop.eup %5580  ;;  %5596 = vtanh.f32 %v2872_v54  ;;  %v2943_v59 = vadd.f32 %v2942_v57, %v6642_v48  ;;  %v2944_v61 = vpop.f32.mrb[79].mxu0 }
 0x400   : > { %v5583_v62 = vpop.eup %5582  ;;  %5598 = vtanh.f32 %v2874_v0  ;;  %v2945_v63 = vadd.f32 %v2944_v61, %v6642_v48  ;;  %v3025_v2 = vpop.f32.mrb[78].mxu1 }
 0x401   : > { %v5585_v3 = vpop.eup %5584  ;;  %5600 = vtanh.f32 %v2943_v59  ;;  %v3026_v4 = vadd.f32 %v3025_v2, %v6642_v48  ;;  %v3027_v41 = vpop.f32.mrb[79].mxu1 }
 0x402   : > { %v5587_v6 = vpop.eup %5586  ;;  %5602 = vtanh.f32 %v2945_v63  ;;  %v3028_v7 = vadd.f32 %v3027_v41, %v6642_v48  ;;  %v2948_v55 = vpop.f32.mrb[80].mxu0  ;;  %v5175_v8 = vpack.c.bf16 %v5585_v3, %v5577_v53 }
 0x403   : > { %v5589_v56 = vpop.eup %5588  ;;  %5604 = vtanh.f32 %v3026_v4  ;;  %v2949_v10 = vadd.f32 %v2948_v55, %v6647_v38  ;;  %v2950_v26 = vpop.f32.mrb[81].mxu0  ;;  %v5173_v12 = vpack.c.bf16 %v5587_v6, %v5579_v37  ;;  %v6699_v37 = vld [vmem:[%s6927_s1 + $0x70] sm:$0xff] }
 0x404   : > { %v5591_v13 = vpop.eup %5590  ;;  %5606 = vtanh.f32 %v3028_v7  ;;  %v2951_v14 = vadd.f32 %v2950_v26, %v6647_v38  ;;  %v3031_v15 = vpop.f32.mrb[80].mxu1  ;;  %v5179_v16 = vpack.c.bf16 %v5589_v56, %v5581_v58 }
 0x405   : > { %5608 = vtanh.f32 %v2949_v10  ;;  %v3032_v19 = vadd.f32 %v3031_v15, %v6647_v38  ;;  %v3033_v21 = vpop.f32.mrb[81].mxu1  ;;  %5174 = vmatprep.subr.bf16.mxu0 %v5173_v12  ;;  %v5177_v1 = vpack.c.bf16 %v5591_v13, %v5583_v62 }
 0x406   : > { %v5593_v22 = vpop.eup %5592  ;;  %5610 = vtanh.f32 %v2951_v14  ;;  %v3034_v23 = vadd.f32 %v3033_v21, %v6647_v38  ;;  %v2954_v24 = vpop.f32.mrb[82].mxu0  ;;  %5176 = vmatpush1.bf16.msra.mxu0 %v5175_v8 }
 0x407   : > { %5612 = vtanh.f32 %v3032_v19  ;;  %v2955_v25 = vadd.f32 %v2954_v24, %v6654_v49  ;;  %v2956_v20 = vpop.f32.mrb[83].mxu0  ;;  %3458 = vmatprep.subr.mxu0 %v5593_v22  ;;  %5178 = vmatprep.subr.bf16.mxu1 %v5177_v1  ;;  %v5595_v9 = vpop.eup %5594 }
 0x408   : > { %5614 = vtanh.f32 %v3034_v23  ;;  %v2957_v27 = vadd.f32 %v2956_v20, %v6654_v49  ;;  %5180 = vmatpush1.bf16.msra.mxu1 %v5179_v16 }
 0x409   : > { %v5597_v30 = vpop.eup %5596  ;;  %v3037_v31 = vpop.f32.mrb[82].mxu1 }
 0x40a   : > { %v5599_v32 = vpop.eup %5598  ;;  %5616 = vtanh.f32 %v2957_v27  ;;  %v3038_v33 = vadd.f32 %v3037_v31, %v6654_v49  ;;  %v3039_v60 = vpop.f32.mrb[83].mxu1  ;;  %3459 = vmatpush1.msra.mxu0 %v5595_v9 }
 0x40b   : > { %v5601_v34 = vpop.eup %5600  ;;  %5618 = vtanh.f32 %v2955_v25  ;;  %v3040_v35 = vadd.f32 %v3039_v60, %v6654_v49  ;;  %v3108_v36 = vpop.f32.mrb[84].mxu0  ;;  %3541 = vmatprep.subr.mxu1 %v5599_v32  ;;  %5006 = vmatmul.mubr.msk.f32.vlgmr.msra.gmra.mrb[96].mxu0 %vm468_vm0, %v6673_v29 }
 0x40c   : > { %v5603_v11 = vpop.eup %5602  ;;  %5620 = vtanh.f32 %v3038_v33  ;;  %v3109_v17 = vadd.f32 %v3108_v36, %v6642_v48  ;;  %v3110_v40 = vpop.f32.mrb[85].mxu0  ;;  %3542 = vmatpush1.msra.mxu1 %v5597_v30  ;;  %3524 = vmatprep.mubr.f32.mxu0 %v6585_v39 }
 0x40d   : > { %v5605_v43 = vpop.eup %5604  ;;  %5622 = vtanh.f32 %v3040_v35  ;;  %v3111_v28 = vadd.f32 %v3110_v40, %v6642_v48  ;;  %v3191_v44 = vpop.f32.mrb[84].mxu1  ;;  %5009 = vmatmul.mubr.msk.f32.vlgmr.msra.gmra.mrb[96].mxu1 %vm468_vm0, %v6673_v29 }
 0x40e   : > { %v5607_v45 = vpop.eup %5606  ;;  %5624 = vtanh.f32 %v3109_v17  ;;  %v3192_v46 = vadd.f32 %v3191_v44, %v6642_v48  ;;  %v3193_v47 = vpop.f32.mrb[85].mxu1  ;;  %3607 = vmatprep.mubr.f32.mxu1 %v6585_v39 }
 0x40f   : > { %v5609_v50 = vpop.eup %5608  ;;  %5626 = vtanh.f32 %v3111_v28  ;;  %v3194_v51 = vadd.f32 %v3193_v47, %v6642_v48  ;;  %v3114_v18 = vpop.f32.mrb[86].mxu0  ;;  %5007 = vmatmul.mubr.msk.f32.gmra.mrb[98].mxu0 %vm468_vm0, %v6684_v42 }
 0x410   : > { %v5611_v52 = vpop.eup %5610  ;;  %5628 = vtanh.f32 %v3192_v46  ;;  %v3115_v53 = vadd.f32 %v3114_v18, %v6647_v38  ;;  %v3116_v54 = vpop.f32.mrb[87].mxu0  ;;  %3530 = vmatprep.mubr.f32.mxu0 %v6585_v39  ;;  %v5183_v5 = vpack.c.bf16 %v5609_v50, %v5601_v34 }
 0x411   : > { %v5613_v0 = vpop.eup %5612  ;;  %5630 = vtanh.f32 %v3194_v51  ;;  %v3117_v57 = vadd.f32 %v3116_v54, %v6647_v38  ;;  %v3197_v58 = vpop.f32.mrb[86].mxu1  ;;  %5010 = vmatmul.mubr.msk.f32.gmra.mrb[98].mxu1 %vm468_vm0, %v6684_v42  ;;  %v5181_v59 = vpack.c.bf16 %v5611_v52, %v5603_v11 }
 0x412   : > { %v5615_v61 = vpop.eup %5614  ;;  %5632 = vtanh.f32 %v3115_v53  ;;  %v3198_v62 = vadd.f32 %v3197_v58, %v6647_v38  ;;  %v3199_v63 = vpop.f32.mrb[87].mxu1  ;;  %3613 = vmatprep.mubr.f32.mxu1 %v6585_v39  ;;  %v5187_v2 = vpack.c.bf16 %v5613_v0, %v5605_v43 }
 0x413   : > { %5634 = vtanh.f32 %v3117_v57  ;;  %v3200_v3 = vadd.f32 %v3199_v63, %v6647_v38  ;;  %v3120_v4 = vpop.f32.mrb[88].mxu0  ;;  %5182 = vmatprep.subr.bf16.mxu0 %v5181_v59  ;;  %5008 = vmatmul.mubr.msk.f32.gmra.mrb[100].mxu0 %vm468_vm0, %v6699_v37  ;;  %v5185_v41 = vpack.c.bf16 %v5615_v61, %v5607_v45 }
 0x414   : > { %v5617_v6 = vpop.eup %5616  ;;  %5636 = vtanh.f32 %v3198_v62  ;;  %v3121_v7 = vadd.f32 %v3120_v4, %v6654_v49  ;;  %v3122_v55 = vpop.f32.mrb[89].mxu0  ;;  %5184 = vmatpush1.bf16.msra.mxu0 %v5183_v5  ;;  %3684 = vmatprep.mubr.f32.mxu0 %v6585_v39 }
 0x415   : > { %v5619_v8 = vpop.eup %5618  ;;  %5638 = vtanh.f32 %v3200_v3  ;;  %v3123_v56 = vadd.f32 %v3122_v55, %v6654_v49  ;;  %v3203_v10 = vpop.f32.mrb[88].mxu1  ;;  %3624 = vmatprep.subr.mxu0 %v5617_v6  ;;  %5186 = vmatprep.subr.bf16.mxu1 %v5185_v41 }
 0x416   : > { %v5621_v26 = vpop.eup %5620  ;;  %5640 = vtanh.f32 %v3121_v7  ;;  %v3204_v12 = vadd.f32 %v3203_v10, %v6654_v49  ;;  %v3205_v13 = vpop.f32.mrb[89].mxu1  ;;  %5188 = vmatpush1.bf16.msra.mxu1 %v5187_v2 }
 0x417   : > { %v5623_v14 = vpop.eup %5622  ;;  %5642 = vtanh.f32 %v3123_v56  ;;  %v3206_v15 = vadd.f32 %v3205_v13, %v6654_v49  ;;  %v3274_v16 = vpop.f32.mrb[90].mxu0  ;;  %5011 = vmatmul.mubr.msk.f32.gmra.mrb[100].mxu1 %vm468_vm0, %v6699_v37 }
 0x418   : > { %v5625_v19 = vpop.eup %5624  ;;  %5644 = vtanh.f32 %v3204_v12  ;;  %v3275_v21 = vadd.f32 %v3274_v16, %v6642_v48  ;;  %v3276_v1 = vpop.f32.mrb[91].mxu0  ;;  %3707 = vmatprep.subr.mxu1 %v5623_v14  ;;  %3625 = vmatpush1.msra.mxu0 %v5619_v8 }
 0x419   : > { %v5627_v22 = vpop.eup %5626  ;;  %5646 = vtanh.f32 %v3206_v15  ;;  %v3277_v23 = vadd.f32 %v3276_v1, %v6642_v48  ;;  %v3357_v24 = vpop.f32.mrb[90].mxu1  ;;  %5012 = vmatmul.mubr.msk.f32.vlgmr.msra.gmra.mrb[102].mxu0 %vm468_vm0, %v6673_v29  ;;  %3767 = vmatprep.mubr.f32.mxu1 %v6585_v39 }
 0x41a   : > { %v5629_v25 = vpop.eup %5628  ;;  %5648 = vtanh.f32 %v3275_v21  ;;  %v3358_v20 = vadd.f32 %v3357_v24, %v6642_v48  ;;  %v3359_v9 = vpop.f32.mrb[91].mxu1  ;;  %3708 = vmatpush1.msra.mxu1 %v5621_v26  ;;  %3690 = vmatprep.mubr.f32.mxu0 %v6585_v39 }
 0x41b   : > { %v5631_v27 = vpop.eup %5630  ;;  %5650 = vtanh.f32 %v3277_v23  ;;  %v3360_v30 = vadd.f32 %v3359_v9, %v6642_v48  ;;  %v3280_v31 = vpop.f32.mrb[92].mxu0  ;;  %5015 = vmatmul.mubr.msk.f32.vlgmr.msra.gmra.mrb[102].mxu1 %vm468_vm0, %v6673_v29 }
 0x41c   : > { %v5633_v32 = vpop.eup %5632  ;;  %5652 = vtanh.f32 %v3358_v20  ;;  %v3281_v33 = vadd.f32 %v3280_v31, %v6647_v38  ;;  %v3282_v60 = vpop.f32.mrb[93].mxu0  ;;  %3773 = vmatprep.mubr.f32.mxu1 %v6585_v39 }
 0x41d   : > { %v5635_v34 = vpop.eup %5634  ;;  %5654 = vtanh.f32 %v3360_v30  ;;  %v3283_v35 = vadd.f32 %v3282_v60, %v6647_v38  ;;  %v3363_v36 = vpop.f32.mrb[92].mxu1  ;;  %5013 = vmatmul.mubr.msk.f32.gmra.mrb[104].mxu0 %vm468_vm0, %v6684_v42  ;;  %v5191_v48 = vpack.c.bf16 %v5633_v32, %v5625_v19 }
 0x41e   : > { %v5637_v11 = vpop.eup %5636  ;;  %5656 = vtanh.f32 %v3281_v33  ;;  %v3364_v17 = vadd.f32 %v3363_v36, %v6647_v38  ;;  %v3365_v40 = vpop.f32.mrb[93].mxu1  ;;  %v5189_v43 = vpack.c.bf16 %v5635_v34, %v5627_v22  ;;  %3696 = vmatprep.mubr.f32.mxu0 %v6585_v39 }
 0x41f   : > { %v5639_v28 = vpop.eup %5638  ;;  %5658 = vtanh.f32 %v3283_v35  ;;  %v3366_v44 = vadd.f32 %v3365_v40, %v6647_v38  ;;  %v3286_v45 = vpop.f32.mrb[94].mxu0  ;;  %5016 = vmatmul.mubr.msk.f32.gmra.mrb[104].mxu1 %vm468_vm0, %v6684_v42  ;;  %v5195_v46 = vpack.c.bf16 %v5637_v11, %v5629_v25 }
 0x420   : > { %v5641_v47 = vpop.eup %5640  ;;  %5660 = vtanh.f32 %v3364_v17  ;;  %v3288_v50 = vpop.f32.mrb[95].mxu0  ;;  %5190 = vmatprep.subr.bf16.mxu0 %v5189_v43  ;;  %v5193_v51 = vpack.c.bf16 %v5639_v28, %v5631_v27  ;;  %3779 = vmatprep.mubr.f32.mxu1 %v6585_v39  ;;  %v3287_v0 = vadd.f32 %v3286_v45, %v6654_v49 }
 0x421   : > { %v5643_v18 = vpop.eup %5642  ;;  %5662 = vtanh.f32 %v3366_v44  ;;  %v3289_v52 = vadd.f32 %v3288_v50, %v6654_v49  ;;  %v3369_v53 = vpop.f32.mrb[94].mxu1  ;;  %5192 = vmatpush1.bf16.msra.mxu0 %v5191_v48 }
 0x422   : > { %v5645_v54 = vpop.eup %5644  ;;  %v3371_v38 = vpop.f32.mrb[95].mxu1  ;;  %5014 = vmatmul.mubr.msk.f32.gmra.mrb[106].mxu0 %vm468_vm0, %v6699_v37  ;;  %3790 = vmatprep.subr.mxu0 %v5643_v18  ;;  %v3370_v61 = vadd.f32 %v3369_v53, %v6654_v49 }
 0x423   : > { %v5647_v5 = vpop.eup %5646  ;;  %5664 = vtanh.f32 %v3289_v52  ;;  %v3372_v57 = vadd.f32 %v3371_v38, %v6654_v49  ;;  %5194 = vmatprep.subr.bf16.mxu1 %v5193_v51  ;;  %5017 = vmatmul.mubr.msk.f32.gmra.mrb[106].mxu1 %vm468_vm0, %v6699_v37  ;;  %v6788_v21 = vpop.permute.xlu1 %3437 }
 0x424   : > { %v5649_v58 = vpop.eup %5648  ;;  %5196 = vmatpush1.bf16.msra.mxu1 %v5195_v46  ;;  %3850 = vmatprep.mubr.f32.mxu0 %v6585_v39 }
 0x425   : > { %v5651_v59 = vpop.eup %5650  ;;  %5666 = vtanh.f32 %v3372_v57  ;;  %3873 = vmatprep.subr.mxu1 %v5647_v5  ;;  %3791 = vmatpush1.msra.mxu0 %v5641_v47 }
 0x426   : > { %v5653_v62 = vpop.eup %5652  ;;  %5018 = vmatmul.mubr.msk.f32.vlgmr.msra.gmra.mrb[108].mxu0 %vm468_vm0, %v6673_v29  ;;  %3933 = vmatprep.mubr.f32.mxu1 %v6585_v39  ;;  %5668 = vtanh.f32 %v3287_v0 }
 0x427   : > { %v5655_v63 = vpop.eup %5654  ;;  %3856 = vmatprep.mubr.f32.mxu0 %v6585_v39  ;;  %5670 = vtanh.f32 %v3370_v61 }
 0x428   : > { %v5657_v2 = vpop.eup %5656  ;;  %3874 = vmatpush1.msra.mxu1 %v5645_v54 }
 0x429   : > { %v5659_v3 = vpop.eup %5658  ;;  %5021 = vmatmul.mubr.msk.f32.vlgmr.msra.gmra.mrb[108].mxu1 %vm468_vm0, %v6673_v29  ;;  %v5199_v49 = vpack.c.bf16 %v5657_v2, %v5649_v58 }
 0x42a   : > { %v5661_v4 = vpop.eup %5660  ;;  %5019 = vmatmul.mubr.msk.f32.gmra.mrb[110].mxu0 %vm468_vm0, %v6684_v42  ;;  %3939 = vmatprep.mubr.f32.mxu1 %v6585_v39  ;;  %v5197_v41 = vpack.c.bf16 %v5659_v3, %v5651_v59 }
 0x42b   : > { %v5663_v6 = vpop.eup %5662  ;;  %3862 = vmatprep.mubr.f32.mxu0 %v6585_v39  ;;  %v5203_v7 = vpack.c.bf16 %v5661_v4, %v5653_v62 }
 0x42c   : > { %5198 = vmatprep.subr.bf16.mxu0 %v5197_v41  ;;  %v5201_v55 = vpack.c.bf16 %v5663_v6, %v5655_v63 }
 0x42d   : > { %v5665_v8 = vpop.eup %5664  ;;  %5022 = vmatmul.mubr.msk.f32.gmra.mrb[110].mxu1 %vm468_vm0, %v6684_v42  ;;  %5200 = vmatpush1.bf16.msra.mxu0 %v5199_v49 }
 0x42e   : > { %5020 = vmatmul.mubr.msk.f32.gmra.mrb[112].mxu0 %vm468_vm0, %v6699_v37  ;;  %3956 = vmatprep.subr.mxu0 %v5665_v8 }
 0x42f   : > { %v5667_v56 = vpop.eup %5666  ;;  %5202 = vmatprep.subr.bf16.mxu1 %v5201_v55  ;;  %3945 = vmatprep.mubr.f32.mxu1 %v6585_v39 }
 0x430   : > { %5204 = vmatpush1.bf16.msra.mxu1 %v5203_v7  ;;  %4016 = vmatprep.mubr.f32.mxu0 %v6585_v39  ;;  %v5669_v10 = vpop.eup %5668 }
 0x431   : > { %5023 = vmatmul.mubr.msk.f32.gmra.mrb[112].mxu1 %vm468_vm0, %v6699_v37  ;;  %4039 = vmatprep.subr.mxu1 %v5667_v56  ;;  %v5671_v26 = vpop.eup %5670 }
 0x432   : > { %3957 = vmatpush1.msra.mxu0 %v5669_v10  ;;  %4099 = vmatprep.mubr.f32.mxu1 %v6585_v39  ;;  %v6813_v10 = vld [vmem:[%s6929_s3] sm:$0xff] }
 0x433   : > { %5024 = vmatmul.mubr.msk.f32.vlgmr.msra.gmra.mrb[114].mxu0 %vm468_vm0, %v6673_v29 }
 0x434   : > { %4040 = vmatpush1.msra.mxu1 %v5671_v26  ;;  %4022 = vmatprep.mubr.f32.mxu0 %v6585_v39 }
 0x435   : > { %5027 = vmatmul.mubr.msk.f32.vlgmr.msra.gmra.mrb[114].mxu1 %vm468_vm0, %v6673_v29  ;;  %v6783_v29 = vpop.permute.xlu0 %3432 }
 0x436   : > { %4105 = vmatprep.mubr.f32.mxu1 %v6585_v39 }
 0x437   : > { %5025 = vmatmul.mubr.msk.f32.gmra.mrb[116].mxu0 %vm468_vm0, %v6684_v42 }
 0x438   : > { %4028 = vmatprep.mubr.f32.mxu0 %v6585_v39 }
 0x439   : > { %5028 = vmatmul.mubr.msk.f32.gmra.mrb[116].mxu1 %vm468_vm0, %v6684_v42  ;;  %v6795_v31 = vpop.permute.xlu0 %3442 }
 0x43a   : > { %4111 = vmatprep.mubr.f32.mxu1 %v6585_v39 }
 0x43b   : > { %5026 = vmatmul.mubr.msk.f32.gmra.mrb[118].mxu0 %vm468_vm0, %v6699_v37 }
 0x43c   : > { %4240 = vmatprep.mubr.f32.mxu0 %v6585_v39 }
 0x43d   : > { %5029 = vmatmul.mubr.msk.f32.gmra.mrb[118].mxu1 %vm468_vm0, %v6699_v37 }
 0x43e   : > { %4311 = vmatprep.mubr.f32.mxu1 %v6585_v39 }
 0x4de   : > { %v3520_v12 = vpop.f32.mrb[96].mxu0 }
 0x4df   : > { %v3521_v13 = vadd.f32 %v3520_v12, %v6783_v29  ;;  %v3522_v14 = vpop.f32.mrb[97].mxu0 }
 0x4e0   : > { %v3523_v42 = vadd.f32 %v3522_v14, %v6783_v29  ;;  %v3603_v15 = vpop.f32.mrb[96].mxu1 }
 0x4e1   : > { %5672 = vtanh.f32 %v3521_v13  ;;  %v3604_v16 = vadd.f32 %v3603_v15, %v6783_v29  ;;  %v3605_v19 = vpop.f32.mrb[97].mxu1 }
 0x4e2   : > { %5674 = vtanh.f32 %v3523_v42  ;;  %v3606_v37 = vadd.f32 %v3605_v19, %v6783_v29  ;;  %v3526_v1 = vpop.f32.mrb[98].mxu0 }
 0x4e3   : > { %5676 = vtanh.f32 %v3604_v16  ;;  %v3527_v22 = vadd.f32 %v3526_v1, %v6788_v21  ;;  %v3528_v23 = vpop.f32.mrb[99].mxu0 }
 0x4e4   : > { %5678 = vtanh.f32 %v3606_v37  ;;  %v3529_v24 = vadd.f32 %v3528_v23, %v6788_v21  ;;  %v3609_v25 = vpop.f32.mrb[98].mxu1 }
 0x4e5   : > { %5680 = vtanh.f32 %v3527_v22  ;;  %v3610_v20 = vadd.f32 %v3609_v25, %v6788_v21  ;;  %v3611_v9 = vpop.f32.mrb[99].mxu1 }
 0x4e6   : > { %5682 = vtanh.f32 %v3529_v24  ;;  %v3612_v27 = vadd.f32 %v3611_v9, %v6788_v21  ;;  %v3532_v30 = vpop.f32.mrb[100].mxu0 }
 0x4e7   : > { %5684 = vtanh.f32 %v3610_v20  ;;  %v3534_v32 = vpop.f32.mrb[101].mxu0  ;;  %v3533_v33 = vadd.f32 %v3532_v30, %v6795_v31 }
 0x4e8   : > { %5686 = vtanh.f32 %v3612_v27  ;;  %v3535_v60 = vadd.f32 %v3534_v32, %v6795_v31 }
 0x4ea   : > { %5688 = vtanh.f32 %v3535_v60  ;;  %v3615_v34 = vpop.f32.mrb[100].mxu1 }
 0x4eb   : > { %v5673_v35 = vpop.eup %5672  ;;  %v3616_v36 = vadd.f32 %v3615_v34, %v6795_v31  ;;  %v3617_v48 = vpop.f32.mrb[101].mxu1  ;;  %5690 = vtanh.f32 %v3533_v33 }
 0x4ec   : > { %v5675_v11 = vpop.eup %5674  ;;  %v3618_v17 = vadd.f32 %v3617_v48, %v6795_v31  ;;  %v3686_v40 = vpop.f32.mrb[102].mxu0 }
 0x4ed   : > { %v5677_v43 = vpop.eup %5676  ;;  %5692 = vtanh.f32 %v3616_v36  ;;  %v3687_v28 = vadd.f32 %v3686_v40, %v6783_v29  ;;  %v3688_v44 = vpop.f32.mrb[103].mxu0 }
 0x4ee   : > { %v5679_v45 = vpop.eup %5678  ;;  %5694 = vtanh.f32 %v3618_v17  ;;  %v3689_v46 = vadd.f32 %v3688_v44, %v6783_v29  ;;  %v3769_v47 = vpop.f32.mrb[102].mxu1 }
 0x4ef   : > { %v5681_v50 = vpop.eup %5680  ;;  %5696 = vtanh.f32 %v3687_v28  ;;  %v3770_v51 = vadd.f32 %v3769_v47, %v6783_v29  ;;  %v3771_v18 = vpop.f32.mrb[103].mxu1 }
 0x4f0   : > { %v5683_v52 = vpop.eup %5682  ;;  %5698 = vtanh.f32 %v3689_v46  ;;  %v3772_v53 = vadd.f32 %v3771_v18, %v6783_v29  ;;  %v3692_v54 = vpop.f32.mrb[104].mxu0  ;;  %v5207_v38 = vpack.c.bf16 %v5681_v50, %v5673_v35 }
 0x4f1   : > { %v5685_v5 = vpop.eup %5684  ;;  %5700 = vtanh.f32 %v3770_v51  ;;  %v3693_v0 = vadd.f32 %v3692_v54, %v6788_v21  ;;  %v3694_v57 = vpop.f32.mrb[105].mxu0  ;;  %v5205_v58 = vpack.c.bf16 %v5683_v52, %v5675_v11 }
 0x4f2   : > { %v5687_v59 = vpop.eup %5686  ;;  %5702 = vtanh.f32 %v3772_v53  ;;  %v3695_v61 = vadd.f32 %v3694_v57, %v6788_v21  ;;  %v3775_v62 = vpop.f32.mrb[104].mxu1  ;;  %v5211_v63 = vpack.c.bf16 %v5685_v5, %v5677_v43 }
 0x4f3   : > { %5704 = vtanh.f32 %v3693_v0  ;;  %v3776_v2 = vadd.f32 %v3775_v62, %v6788_v21  ;;  %v3777_v3 = vpop.f32.mrb[105].mxu1  ;;  %5206 = vmatprep.subr.bf16.mxu0 %v5205_v58  ;;  %v5209_v49 = vpack.c.bf16 %v5687_v59, %v5679_v45 }
 0x4f4   : > { %v5689_v4 = vpop.eup %5688  ;;  %5706 = vtanh.f32 %v3695_v61  ;;  %v3778_v41 = vadd.f32 %v3777_v3, %v6788_v21  ;;  %5208 = vmatpush1.bf16.msra.mxu0 %v5207_v38 }
 0x4f5   : > { %5708 = vtanh.f32 %v3776_v2  ;;  %v3698_v6 = vpop.f32.mrb[106].mxu0  ;;  %4180 = vmatprep.subr.mxu0 %v5689_v4  ;;  %5210 = vmatprep.subr.bf16.mxu1 %v5209_v49  ;;  %v5691_v7 = vpop.eup %5690  ;;  %v6840_v4 = vld [vmem:[#allocation2 + $0x88] sm:$0xff] }
 0x4f6   : > { %5710 = vtanh.f32 %v3778_v41  ;;  %v3699_v55 = vadd.f32 %v3698_v6, %v6795_v31  ;;  %v3700_v8 = vpop.f32.mrb[107].mxu0  ;;  %v3781_v56 = vpop.f32.mrb[106].mxu1  ;;  %5212 = vmatpush1.bf16.msra.mxu1 %v5211_v63 }
 0x4f7   : > { %v5693_v26 = vpop.eup %5692  ;;  %v3701_v12 = vadd.f32 %v3700_v8, %v6795_v31  ;;  %v3783_v13 = vpop.f32.mrb[107].mxu1  ;;  %v3782_v42 = vadd.f32 %v3781_v56, %v6795_v31 }
 0x4f8   : > { %v5695_v14 = vpop.eup %5694  ;;  %v3784_v15 = vadd.f32 %v3783_v13, %v6795_v31  ;;  %4181 = vmatpush1.msra.mxu0 %v5691_v7 }
 0x4f9   : > { %v5697_v16 = vpop.eup %5696  ;;  %5712 = vtanh.f32 %v3701_v12  ;;  %v3852_v19 = vpop.f32.mrb[108].mxu0  ;;  %4251 = vmatprep.subr.mxu1 %v5695_v14  ;;  %5030 = vmatmul.mubr.msk.f32.vlgmr.msra.gmra.mrb[120].mxu0 %vm468_vm0, %v6813_v10 }
 0x4fa   : > { %v5699_v37 = vpop.eup %5698  ;;  %5714 = vtanh.f32 %v3699_v55  ;;  %v3853_v1 = vadd.f32 %v3852_v19, %v6783_v29  ;;  %v3854_v22 = vpop.f32.mrb[109].mxu0  ;;  %4252 = vmatpush1.msra.mxu1 %v5693_v26  ;;  %4382 = vmatprep.mubr.f32.mxu0 %v6585_v39 }
 0x4fb   : > { %v5701_v23 = vpop.eup %5700  ;;  %5716 = vtanh.f32 %v3784_v15  ;;  %v3855_v24 = vadd.f32 %v3854_v22, %v6783_v29  ;;  %5031 = vmatmul.mubr.msk.f32.vlgmr.msra.gmra.mrb[120].mxu1 %vm468_vm0, %v6813_v10 }
 0x4fc   : > { %v5703_v25 = vpop.eup %5702  ;;  %5718 = vtanh.f32 %v3782_v42  ;;  %v3935_v20 = vpop.f32.mrb[108].mxu1  ;;  %4453 = vmatprep.mubr.f32.mxu1 %v6585_v39 }
 0x4fd   : > { %v5705_v9 = vpop.eup %5704  ;;  %5720 = vtanh.f32 %v3853_v1  ;;  %v3936_v27 = vadd.f32 %v3935_v20, %v6783_v29  ;;  %v3937_v30 = vpop.f32.mrb[109].mxu1 }
 0x4fe   : > { %v3858_v32 = vpop.f32.mrb[110].mxu0  ;;  %v5707_v33 = vpop.eup %5706  ;;  %5722 = vtanh.f32 %v3855_v24  ;;  %v3938_v60 = vadd.f32 %v3937_v30, %v6783_v29  ;;  %v5215_v36 = vpack.c.bf16 %v5705_v9, %v5697_v16 }
 0x4ff   : > { %v3859_v34 = vadd.f32 %v3858_v32, %v6788_v21  ;;  %v3860_v35 = vpop.f32.mrb[111].mxu0  ;;  %v5709_v48 = vpop.eup %5708  ;;  %5724 = vtanh.f32 %v3936_v27  ;;  %v5213_v17 = vpack.c.bf16 %v5707_v33, %v5699_v37 }
 0x500   : > { %v3861_v11 = vadd.f32 %v3860_v35, %v6788_v21  ;;  %v5711_v39 = vpop.eup %5710  ;;  %5726 = vtanh.f32 %v3938_v60  ;;  %v3941_v40 = vpop.f32.mrb[110].mxu1  ;;  %v5219_v43 = vpack.c.bf16 %v5709_v48, %v5701_v23 }
 0x501   : > { %5728 = vtanh.f32 %v3859_v34  ;;  %v3942_v28 = vadd.f32 %v3941_v40, %v6788_v21  ;;  %v3943_v44 = vpop.f32.mrb[111].mxu1  ;;  %v3864_v45 = vpop.f32.mrb[112].mxu0  ;;  %5214 = vmatprep.subr.bf16.mxu0 %v5213_v17  ;;  %v5217_v46 = vpack.c.bf16 %v5711_v39, %v5703_v25 }
 0x502   : > { %5730 = vtanh.f32 %v3861_v11  ;;  %v3944_v47 = vadd.f32 %v3943_v44, %v6788_v21  ;;  %v3865_v50 = vadd.f32 %v3864_v45, %v6795_v31  ;;  %v3866_v51 = vpop.f32.mrb[113].mxu0  ;;  %5216 = vmatpush1.bf16.msra.mxu0 %v5215_v36 }
 0x503   : > { %v5713_v18 = vpop.eup %5712  ;;  %5732 = vtanh.f32 %v3942_v28  ;;  %v3867_v52 = vadd.f32 %v3866_v51, %v6795_v31  ;;  %5218 = vmatprep.subr.bf16.mxu1 %v5217_v46 }
 0x504   : > { %v5715_v53 = vpop.eup %5714  ;;  %5734 = vtanh.f32 %v3944_v47  ;;  %v3947_v54 = vpop.f32.mrb[112].mxu1  ;;  %4322 = vmatprep.subr.mxu0 %v5713_v18  ;;  %5220 = vmatpush1.bf16.msra.mxu1 %v5219_v43 }
 0x505   : > { %v5717_v38 = vpop.eup %5716  ;;  %5736 = vtanh.f32 %v3865_v50  ;;  %v3948_v5 = vadd.f32 %v3947_v54, %v6795_v31  ;;  %v3949_v0 = vpop.f32.mrb[113].mxu1 }
 0x506   : > { %v5719_v57 = vpop.eup %5718  ;;  %5738 = vtanh.f32 %v3867_v52  ;;  %v3950_v58 = vadd.f32 %v3949_v0, %v6795_v31  ;;  %v4018_v59 = vpop.f32.mrb[114].mxu0  ;;  %4393 = vmatprep.subr.mxu1 %v5717_v38  ;;  %4323 = vmatpush1.msra.mxu0 %v5715_v53 }
 0x507   : > { %v5721_v61 = vpop.eup %5720  ;;  %5740 = vtanh.f32 %v3948_v5  ;;  %v4019_v62 = vadd.f32 %v4018_v59, %v6783_v29  ;;  %v4020_v63 = vpop.f32.mrb[115].mxu0  ;;  %5032 = vmatmul.mubr.msk.f32.vlgmr.msra.gmra.mrb[122].mxu0 %vm468_vm0, %v6813_v10 }
 0x508   : > { %v5723_v2 = vpop.eup %5722  ;;  %5742 = vtanh.f32 %v3950_v58  ;;  %v4021_v3 = vadd.f32 %v4020_v63, %v6783_v29  ;;  %v4101_v49 = vpop.f32.mrb[114].mxu1  ;;  %4394 = vmatpush1.msra.mxu1 %v5719_v57  ;;  %4524 = vmatprep.mubr.f32.mxu0 %v6840_v4 }
 0x509   : > { %v5725_v41 = vpop.eup %5724  ;;  %5744 = vtanh.f32 %v4019_v62  ;;  %v4102_v6 = vadd.f32 %v4101_v49, %v6783_v29  ;;  %v4103_v7 = vpop.f32.mrb[115].mxu1  ;;  %5033 = vmatmul.mubr.msk.f32.vlgmr.msra.gmra.mrb[122].mxu1 %vm468_vm0, %v6813_v10 }
 0x50a   : > { %v5727_v55 = vpop.eup %5726  ;;  %5746 = vtanh.f32 %v4021_v3  ;;  %v4104_v8 = vadd.f32 %v4103_v7, %v6783_v29  ;;  %v4024_v56 = vpop.f32.mrb[116].mxu0  ;;  %4595 = vmatprep.mubr.f32.mxu1 %v6840_v4 }
 0x50b   : > { %v5729_v26 = vpop.eup %5728  ;;  %5748 = vtanh.f32 %v4102_v6  ;;  %v4025_v12 = vadd.f32 %v4024_v56, %v6788_v21  ;;  %v4026_v13 = vpop.f32.mrb[117].mxu0 }
 0x50c   : > { %v5731_v14 = vpop.eup %5730  ;;  %5750 = vtanh.f32 %v4104_v8  ;;  %v4027_v42 = vadd.f32 %v4026_v13, %v6788_v21  ;;  %v4107_v15 = vpop.f32.mrb[116].mxu1  ;;  %v5223_v16 = vpack.c.bf16 %v5729_v26, %v5721_v61 }
 0x50d   : > { %v5733_v19 = vpop.eup %5732  ;;  %5752 = vtanh.f32 %v4025_v12  ;;  %v4108_v37 = vadd.f32 %v4107_v15, %v6788_v21  ;;  %v4109_v1 = vpop.f32.mrb[117].mxu1  ;;  %v5221_v29 = vpack.c.bf16 %v5731_v14, %v5723_v2 }
 0x50e   : > { %v5735_v22 = vpop.eup %5734  ;;  %5754 = vtanh.f32 %v4027_v42  ;;  %v4110_v23 = vadd.f32 %v4109_v1, %v6788_v21  ;;  %v4030_v24 = vpop.f32.mrb[118].mxu0  ;;  %v5227_v25 = vpack.c.bf16 %v5733_v19, %v5725_v41 }
 0x50f   : > { %v5737_v20 = vpop.eup %5736  ;;  %5756 = vtanh.f32 %v4108_v37  ;;  %v4032_v9 = vpop.f32.mrb[119].mxu0  ;;  %5222 = vmatprep.subr.bf16.mxu0 %v5221_v29  ;;  %v5225_v27 = vpack.c.bf16 %v5735_v22, %v5727_v55  ;;  %v4031_v34 = vadd.f32 %v4030_v24, %v6795_v31 }
 0x510   : > { %v5739_v30 = vpop.eup %5738  ;;  %5758 = vtanh.f32 %v4110_v23  ;;  %v4033_v32 = vadd.f32 %v4032_v9, %v6795_v31  ;;  %v4113_v33 = vpop.f32.mrb[118].mxu1  ;;  %5224 = vmatpush1.bf16.msra.mxu0 %v5223_v16 }
 0x511   : > { %v5741_v60 = vpop.eup %5740  ;;  %v4115_v35 = vpop.f32.mrb[119].mxu1  ;;  %4464 = vmatprep.subr.mxu0 %v5739_v30  ;;  %5226 = vmatprep.subr.bf16.mxu1 %v5225_v27  ;;  %v4114_v11 = vadd.f32 %v4113_v33, %v6795_v31 }
 0x512   : > { %v5743_v21 = vpop.eup %5742  ;;  %5760 = vtanh.f32 %v4033_v32  ;;  %v4116_v36 = vadd.f32 %v4115_v35, %v6795_v31  ;;  %5228 = vmatpush1.bf16.msra.mxu1 %v5227_v25  ;;  %v4171_v54 = vpop.permute.xlu1 %4170 }
 0x513   : > { %v5745_v48 = vpop.eup %5744  ;;  %4535 = vmatprep.subr.mxu1 %v5743_v21 }
 0x514   : > { %v5747_v17 = vpop.eup %5746  ;;  %5762 = vtanh.f32 %v4116_v36  ;;  %4465 = vmatpush1.msra.mxu0 %v5737_v20 }
 0x515   : > { %v5749_v39 = vpop.eup %5748  ;;  %5764 = vtanh.f32 %v4031_v34  ;;  %5034 = vmatmul.mubr.msk.f32.vlgmr.msra.gmra.mrb[124].mxu0 %vm468_vm0, %v6813_v10 }
 0x516   : > { %v5751_v40 = vpop.eup %5750  ;;  %4536 = vmatpush1.msra.mxu1 %v5741_v60  ;;  %4666 = vmatprep.mubr.f32.mxu0 %v6840_v4  ;;  %5766 = vtanh.f32 %v4114_v11 }
 0x517   : > { %v5753_v43 = vpop.eup %5752  ;;  %5035 = vmatmul.mubr.msk.f32.vlgmr.msra.gmra.mrb[124].mxu1 %vm468_vm0, %v6813_v10 }
 0x518   : > { %v5755_v28 = vpop.eup %5754  ;;  %v5231_v31 = vpack.c.bf16 %v5753_v43, %v5745_v48  ;;  %4737 = vmatprep.mubr.f32.mxu1 %v6840_v4 }
 0x519   : > { %v5757_v44 = vpop.eup %5756  ;;  %v5229_v45 = vpack.c.bf16 %v5755_v28, %v5747_v17 }
 0x51a   : > { %v5759_v46 = vpop.eup %5758  ;;  %v5235_v47 = vpack.c.bf16 %v5757_v44, %v5749_v39 }
 0x51b   : > { %5230 = vmatprep.subr.bf16.mxu0 %v5229_v45  ;;  %v5233_v50 = vpack.c.bf16 %v5759_v46, %v5751_v40 }
 0x51c   : > { %v5761_v51 = vpop.eup %5760  ;;  %5232 = vmatpush1.bf16.msra.mxu0 %v5231_v31 }
 0x51d   : > { %4606 = vmatprep.subr.mxu0 %v5761_v51  ;;  %5234 = vmatprep.subr.bf16.mxu1 %v5233_v50 }
 0x51e   : > { %v5763_v18 = vpop.eup %5762  ;;  %5236 = vmatpush1.bf16.msra.mxu1 %v5235_v47 }
 0x51f   : > { %v5765_v52 = vpop.eup %5764  ;;  %4677 = vmatprep.subr.mxu1 %v5763_v18 }
 0x520   : > { %4607 = vmatpush1.msra.mxu0 %v5765_v52  ;;  %v5767_v53 = vpop.eup %5766 }
 0x521   : > { %5036 = vmatmul.mubr.msk.f32.vlgmr.msra.gmra.mrb[126].mxu0 %vm468_vm0, %v6813_v10 }
 0x522   : > { %4678 = vmatpush1.msra.mxu1 %v5767_v53 }
 0x523   : > { %5037 = vmatmul.mubr.msk.f32.vlgmr.msra.gmra.mrb[126].mxu1 %vm468_vm0, %v6813_v10 }
 0x5cc   : > { %v4242_v38 = vpop.f32.mrb[120].mxu0 }
 0x5cd   : > { %v4243_v5 = vadd.f32 %v4242_v38, %v4171_v54  ;;  %v4244_v0 = vpop.f32.mrb[121].mxu0 }
 0x5ce   : > { %v4245_v57 = vadd.f32 %v4244_v0, %v4171_v54  ;;  %v4313_v58 = vpop.f32.mrb[120].mxu1 }
 0x5cf   : > { %v4314_v59 = vadd.f32 %v4313_v58, %v4171_v54  ;;  %v4315_v61 = vpop.f32.mrb[121].mxu1 }
 0x5d0   : > { %v4760_v62 = vcombine.low %v4243_v5, %v4245_v57  ;;  %v4316_v63 = vadd.f32 %v4315_v61, %v4171_v54 }
 0x5d2   : > { %4776 = vst [vmem:[%s6867_s26] sm:$0x77] %v4760_v62  ;;  %v4761_v2 = vcombine.low %v4314_v59, %v4316_v63 }
 0x5d4   : > { %4777 = vst [vmem:[%s6867_s26 + $0x8] sm:$0x77] %v4761_v2 }
 0x5da   : > { %v4384_v10 = vpop.f32.mrb[122].mxu0 }
 0x5db   : > { %v4385_v3 = vadd.f32 %v4384_v10, %v4171_v54  ;;  %v4386_v49 = vpop.f32.mrb[123].mxu0 }
 0x5dc   : > { %v4387_v4 = vadd.f32 %v4386_v49, %v4171_v54  ;;  %v4455_v41 = vpop.f32.mrb[122].mxu1 }
 0x5dd   : > { %v4456_v6 = vadd.f32 %v4455_v41, %v4171_v54  ;;  %v4457_v7 = vpop.f32.mrb[123].mxu1 }
 0x5de   : > { %v4762_v55 = vcombine.low %v4385_v3, %v4387_v4  ;;  %v4458_v8 = vadd.f32 %v4457_v7, %v4171_v54 }
 0x5e0   : > { %4778 = vst [vmem:[%s6867_s26 + $0x10] sm:$0x77] %v4762_v55  ;;  %v4763_v56 = vcombine.low %v4456_v6, %v4458_v8 }
 0x5e2   : > { %4779 = vst [vmem:[%s6867_s26 + $0x18] sm:$0x77] %v4763_v56 }
 0x5e8   : > { %v4526_v26 = vpop.f32.mrb[124].mxu0 }
 0x5e9   : > { %v4527_v12 = vadd.f32 %v4526_v26, %v4171_v54  ;;  %v4528_v13 = vpop.f32.mrb[125].mxu0 }
 0x5ea   : > { %v4529_v14 = vadd.f32 %v4528_v13, %v4171_v54  ;;  %v4597_v42 = vpop.f32.mrb[124].mxu1 }
 0x5eb   : > { %v4598_v15 = vadd.f32 %v4597_v42, %v4171_v54  ;;  %v4599_v16 = vpop.f32.mrb[125].mxu1 }
 0x5ec   : > { %v4764_v19 = vcombine.low %v4527_v12, %v4529_v14  ;;  %v4600_v37 = vadd.f32 %v4599_v16, %v4171_v54 }
 0x5ee   : > { %4780 = vst [vmem:[%s6867_s26 + $0x20] sm:$0x77] %v4764_v19  ;;  %v4765_v1 = vcombine.low %v4598_v15, %v4600_v37 }
 0x5f0   : > { %4781 = vst [vmem:[%s6867_s26 + $0x28] sm:$0x77] %v4765_v1 }
 0x5f4   : > { %v4668_v29 = vpop.f32.mrb[126].mxu0 }
 0x5f5   : > { %v4669_v22 = vadd.f32 %v4668_v29, %v4171_v54  ;;  %v4670_v23 = vpop.f32.mrb[127].mxu0 }
 0x5f6   : > { %v4671_v24 = vadd.f32 %v4670_v23, %v4171_v54  ;;  %v4739_v25 = vpop.f32.mrb[126].mxu1 }
 0x5f7   : > { %v4740_v20 = vadd.f32 %v4739_v25, %v4171_v54  ;;  %v4741_v9 = vpop.f32.mrb[127].mxu1 }
 0x5f8   : > { %v4766_v27 = vcombine.low %v4669_v22, %v4671_v24  ;;  %v4742_v30 = vadd.f32 %v4741_v9, %v4171_v54 }
 0x5fa   : > { %4782 = vst [vmem:[%s6867_s26 + $0x30] sm:$0x77] %v4766_v27  ;;  %v4767_v32 = vcombine.low %v4740_v20, %v4742_v30 }
 0x5fc   : > { %4783 = vst [vmem:[%s6867_s26 + $0x38] sm:$0x77] %v4767_v32 }
 0x5fd   : > { %5814 = shalt.err (!%p5811_p4)
}
 0x5fe   : > { %s5815_s13 = scalar_lea.hbm %s6881_s10, 1024  ;;  %s5819_s14 = scalar_lea.hbm %s6931_s5, 2048 }
 0x5ff   : > { %p5816_p5 = scmp.ne.s32.totalorder %s6881_s10, %s5815_s13  ;;  %p5820_p0 = scmp.lt.u32.totalorder %s6881_s10, %s6931_s5 }
 0x600   : > { %p5821_p1 = scmp.lt.u32.totalorder %s5819_s14, %s5815_s13  ;;  %p5823_p6 = scmp.lt.u32.totalorder %s5815_s13, %s6881_s10 }
 0x601   : > { %p5817_p8 = pnand %p5816_p5, %p6940_p11 }
 0x602   : > { %p5822_p3 = por %p5821_p1, %p5820_p0 }
 0x603   : > { %p5818_p9 = pneg %p5817_p8 }
 0x604   : > { %p5824_p12 = por %p5823_p6, %p5822_p3 }
 0x606   : > { %p5825_p13 = pnand %p5824_p12, %p5818_p9 }
 0x608   : > { %5828 = shalt.err (!%p5825_p13)
}
 0x609   : > { %5239 = dma.vmem_to_hbm [thread:$0]  (%p6940_p11), %s6883_s8, 1024, %s6881_s10, %s4785_s11  }
 0x60a PF: > { %s4811_s26 = sand.u32 1, %s5855_s18   ;;  %p6941_p7 = scmp.ne.s32.totalorder %s6936_s6, 0 }
 0x60b   : > { %p6942_p10 = scmp.ge.s32.totalorder %s5867_s21, 2  ;;  %s4812_s28 = scalar_lea.sflag [#allocation5], %s4811_s26 }
 0x60d   : > { %p5246_p2 = pnand %p6942_p10, %p6941_p7 }
 0x60f   : > { %5850 = dma.done.wait (!%p5246_p2), %s4812_s28, 1024  }
 0x610   : > { %5852 = vsyncadd (!%p5246_p2), %s4812_s28, 4294966272  ;;  %p18_p4 = scmp.ge.s32.totalorder %s5929_s24, 4   ;;  %s6943_s18 = smov %s5859_s19 }
 0x611   : > { %s6944_s19 = smov %s5863_s20  ;;  %s6945_s20 = smov %s5941_s27 }
 0x612   : > { %s6946_s21 = smov %s5929_s24  ;;  %20 = sbr.rel (!%p18_p4) target bundleno = 5 (0x5), region = 93 }
 0x619   :  { %4817 = vsyncpa [#allocation4], 1 }
 0x61a   :  { %4819 = vsyncpa [#allocation4 + $0x1], 1 }
 0x61b   :  { %4820 = vsyncpa [#allocation5], 1 }
 0x61c   :  { %4822 = vsyncpa [#allocation5 + $0x1], 1 }

</bundles_post_ra>
